<compile_context>
chip_gen: v6e
topology: v6e:2x2x1
jax: 0.10.0
libtpu: 0.0.40
codegen_flags: <defaults>
</compile_context>

<pallas_src>
import functools

import jax
import jax.numpy as jnp
import numpy as np
from jax.experimental import pallas as pl
from jax.experimental.pallas import tpu as pltpu


def _cdiv(a, b):
    return -(-a // b)


def _round_up(x, m):
    return _cdiv(x, m) * m


# ---------------------------------------------------------------------------
# Pallas kernel: accumulates per-kind-group partial sums
#   row 0: sum(mask)           row 1: sum(mask*bce | mask>=0.5)
#   row 2: sum(bce | mask<0.5) row 3: sum(mask*(dx^2+dy^2))
#   row 4: sum(mask*(sqrt(w)-sqrt(w'))^2 + mask*(sqrt(h)-sqrt(h'))^2)
# ---------------------------------------------------------------------------
def _ocr_loss_kernel(o_ref, l_ref, out_ref,
                     acc_mask, acc_hi, acc_lo, acc_coor, acc_size, *, kc):
    eps = 1e-6
    t = pl.program_id(1)

    @pl.when(t == 0)
    def _init():
        z = jnp.zeros_like(acc_mask)
        acc_mask[...] = z
        acc_hi[...] = z
        acc_lo[...] = z
        acc_coor[...] = z
        acc_size[...] = z

    o = o_ref[...]            # (B, 5*kc, Sb, 128), native dtype
    l = l_ref[...]

    # Unrolled loop over the kc folded character kinds in this block.
    for j in range(kc):
        base = 5 * j
        o_resp = o[:, base + 0].astype(jnp.float32)
        l_resp = l[:, base + 0].astype(jnp.float32)
        mask = l_resp

        # binary_cross_entropy(reduction='none'); PyTorch clamps each log at -100.
        log_p = jnp.maximum(jnp.log(o_resp), -100.0)
        log_1mp = jnp.maximum(jnp.log(1.0 - o_resp), -100.0)
        bce = -(l_resp * log_p + (1.0 - l_resp) * log_1mp)
        is_lo = mask < 0.5
        hi = jnp.where(is_lo, 0.0, mask * bce)   # weight == mask       (mask>=0.5)
        lo = jnp.where(is_lo, bce, 0.0)          # weight == ratio*0.5  (mask<0.5)

        # coor loss: mask applies to both x and y channels of this kind.
        dx = o[:, base + 1].astype(jnp.float32) - l[:, base + 1].astype(jnp.float32)
        dy = o[:, base + 2].astype(jnp.float32) - l[:, base + 2].astype(jnp.float32)
        coor = mask * (dx * dx + dy * dy)

        # size loss (epsilon added to both, like slice_tensor).
        sw = (jnp.sqrt(o[:, base + 3].astype(jnp.float32) + eps)
              - jnp.sqrt(l[:, base + 3].astype(jnp.float32) + eps))
        sh = (jnp.sqrt(o[:, base + 4].astype(jnp.float32) + eps)
              - jnp.sqrt(l[:, base + 4].astype(jnp.float32) + eps))
        size = mask * (sw * sw + sh * sh)

        # Pure VPU adds into vreg-shaped accumulators (reduce over the outer
        # batch axis only -> no cross-lane work in the hot loop).
        acc_mask[...] += jnp.sum(mask, axis=0)
        acc_hi[...] += jnp.sum(hi, axis=0)
        acc_lo[...] += jnp.sum(lo, axis=0)
        acc_coor[...] += jnp.sum(coor, axis=0)
        acc_size[...] += jnp.sum(size, axis=0)

    @pl.when(t == pl.num_programs(1) - 1)
    def _finalize():
        def _total(a):  # full reduction that stays rank-2 -> (1, 1)
            return jnp.sum(jnp.sum(a, axis=1, keepdims=True),
                           axis=0, keepdims=True)

        s_mask = _total(acc_mask[...])
        s_hi = _total(acc_hi[...])
        s_lo = _total(acc_lo[...])
        s_coor = _total(acc_coor[...])
        s_size = _total(acc_size[...])

        # Pack the five partial sums into one full (8, 128) store.
        row = jax.lax.broadcasted_iota(jnp.int32, (8, 128), 0)
        out_ref[...] = jnp.where(row == 0, s_mask,
                       jnp.where(row == 1, s_hi,
                       jnp.where(row == 2, s_lo,
                       jnp.where(row == 3, s_coor, s_size))))


# ---------------------------------------------------------------------------
# Wrapper (glue)
# ---------------------------------------------------------------------------
class OCRLossPallas:
    _TARGET_BLOCK_BYTES = 4 * 1024 * 1024   # per input block

    def __init__(self, coefficients, n_kinds_of_characters):
        self.coefficients = tuple(float(c) for c in coefficients)
        self.nc = int(n_kinds_of_characters)

    def __call__(self, output, label):
        B, C, H, W = output.shape
        nc = self.nc
        assert C == 5 * nc, "channel dim must be 5 * n_kinds_of_characters"
        assert label.shape == output.shape
        HW = H * W

        o_item = jnp.dtype(output.dtype).itemsize
        l_item = jnp.dtype(label.dtype).itemsize
        # sublane multiple required by the narrower dtype (f32:8, bf16:16, 8b:32)
        sub_mult = max({4: 8, 2: 16, 1: 32}.get(o_item, 8),
                       {4: 8, 2: 16, 1: 32}.get(l_item, 8))
        max_item = max(o_item, l_item)
        target = self._TARGET_BLOCK_BYTES

        # Lane-dense spatial layout: HW -> (S, 128).
        S = _cdiv(HW, 128)
        per_kind_bytes = B * 5 * S * 128 * max_item

        if per_kind_bytes <= target:
            # Whole spatial extent fits in one tile -> fold kinds to keep
            # each DMA large and the grid-step count small.
            kc = 1
            for d in range(1, nc + 1):
                if nc % d == 0 and d * per_kind_bytes <= target:
                    kc = d
            nt, Sb, Sp = 1, S, S          # full-extent block dim (no 8-mult needed)
        else:
            # Spatial tiling with near-equal tiles (caps padding at a few rows).
            kc = 1
            sb_cap = max(sub_mult,
                         (target // (B * 5 * 128 * max_item)) // sub_mult * sub_mult)
            nt = _cdiv(S, sb_cap)
            Sb = _round_up(_cdiv(S, nt), sub_mult)
            Sp = Sb * nt

        ng = nc // kc
        HW_pad = Sp * 128

        def prep(t):
            t = t.reshape(B, C, HW)       # free reshape (contiguous)
            if HW_pad != HW:
                # Minimal tail pad; padded zeros contribute exactly 0 to every
                # accumulated sum (logs are clamped, mask is 0 there).
                t = jnp.pad(t, ((0, 0), (0, 0), (0, HW_pad - HW)))
            return t.reshape(B, C, Sp, 128)

        x = prep(output)
        y = prep(label)

        kernel = functools.partial(_ocr_loss_kernel, kc=kc)

        in_spec = pl.BlockSpec((B, 5 * kc, Sb, 128), lambda k, t: (0, k, t, 0))
        out_spec = pl.BlockSpec((None, 8, 128), lambda k, t: (k, 0, 0))
        grid = (ng, nt)

        # VMEM budget: 2 inputs x 2 pipeline buffers x block + scratch + out.
        block_bytes = B * 5 * kc * Sb * 128 * (o_item + l_item)
        needed = 2 * block_bytes + 5 * Sb * 128 * 4 + ng * 8 * 128 * 4 * 2
        vmem_limit = int(min(48 << 20, max(32 << 20, needed + (4 << 20))))

        partials = pl.pallas_call(
            kernel,
            out_shape=jax.ShapeDtypeStruct((ng, 8, 128), jnp.float32),
            grid_spec=pltpu.PrefetchScalarGridSpec(
                num_scalar_prefetch=0,
                grid=grid,
                in_specs=[in_spec, in_spec],
                out_specs=out_spec,
                scratch_shapes=[pltpu.VMEM((Sb, 128), jnp.float32)
                                for _ in range(5)],
            ),
            compiler_params=pltpu.CompilerParams(
                # kind axis "parallel" -> v7x megacore split; t is a reduction.
                dimension_semantics=("parallel", "arbitrary"),
                vmem_limit_bytes=vmem_limit),
        )(x, y)

        # Tiny nc-way combine in plain XLA (each kind group wrote rows 0..4).
        s = partials[:, :, 0]                       # (ng, 8)
        s_mask = jnp.sum(s[:, 0])
        s_hi = jnp.sum(s[:, 1])
        s_lo = jnp.sum(s[:, 2])
        s_coor = jnp.sum(s[:, 3])
        s_size = jnp.sum(s[:, 4])

        ratio_of_one = s_mask / float(B * nc * H * W)   # true numel (pre-padding)
        inv_batch = 1.0 / float(B)
        loss_resp = (s_hi + 0.5 * ratio_of_one * s_lo) * inv_batch
        loss_coor = s_coor * inv_batch
        loss_size = s_size * inv_batch
        lam_r, lam_c, lam_s = self.coefficients
        total = lam_r * loss_resp + lam_c * loss_coor + lam_s * loss_size

        # TODO(synk): PyTorch returns Python floats via .item(); we return JAX
        # scalars to avoid a host sync inside traced code.
        return total, [loss_resp, loss_coor, loss_size]


# ---------------------------------------------------------------------------
# Pure-JAX reference (mirrors the PyTorch forward exactly)
# ---------------------------------------------------------------------------
def _ref_ocr_loss(output, label, coefficients, nc):
    resp_idx = np.array([5 * i for i in range(nc)])
    coor_idx = np.array([5 * i + 1 for i in range(nc)]
                        + [5 * i + 2 for i in range(nc)])
    size_idx = np.array([5 * i + 3 for i in range(nc)]
                        + [5 * i + 4 for i in range(nc)])
    eps = 1e-6
    o_resp, l_resp = output[:, resp_idx], label[:, resp_idx]
    o_coor, l_coor = output[:, coor_idx], label[:, coor_idx]
    o_size, l_size = output[:, size_idx] + eps, label[:, size_idx] + eps

    mask = l_resp
    ratio = mask.sum() / mask.size
    weight = jnp.where(mask < 0.5, ratio * 0.5, mask)
    bce = -(l_resp * jnp.maximum(jnp.log(o_resp), -100.0)
            + (1.0 - l_resp) * jnp.maximum(jnp.log(1.0 - o_resp), -100.0))
    mask_bbox = jnp.concatenate([mask, mask], axis=1)

    loss_resp = (weight * bce).sum(axis=(1, 2, 3)).mean()
    loss_coor = (mask_bbox * (o_coor - l_coor) ** 2).sum(axis=(1, 2, 3)).mean()
    loss_size = (mask_bbox * (jnp.sqrt(o_size) - jnp.sqrt(l_size)) ** 2
                 ).sum(axis=(1, 2, 3)).mean()
    lr, lc, ls = coefficients
    return lr * loss_resp + lc * loss_coor + ls * loss_size, [loss_resp,
                                                              loss_coor,
                                                              loss_size]


# ---------------------------------------------------------------------------
if __name__ == "__main__":
    NC = 4                      # config.N_KINDS_OF_CHARACTERS (synthetic)
    COEFFS = (5.0, 1.0, 2.0)
    loss_fn = OCRLossPallas(COEFFS, NC)

    def make_inputs(key, B, H, W):
        C = 5 * NC
        k_out, k_lab = jax.random.split(key)
        # output: predictions, resp channels in (0,1) for BCE, sizes >= 0.
        output = jax.random.uniform(k_out, (B, C, H, W), dtype=jnp.float32,
                                    minval=0.05, maxval=0.95)
        # label: resp channels binary, coor/size channels in [0, 1].
        label = jax.random.uniform(k_lab, (B, C, H, W), dtype=jnp.float32,
                                   minval=0.0, maxval=1.0)
        resp_idx = jnp.array([5 * i for i in range(NC)])
        label = label.at[:, resp_idx].set(
            (label[:, resp_idx] > 0.7).astype(jnp.float32))
        return output, label

    key = jax.random.PRNGKey(0)
    k1, k2 = jax.random.split(key)

    # Case 1: H*W multiple of 128 (no padding path, kinds folded).
    # Case 2: ragged H*W (exercises the minimal tail-pad path).
    for kk, (B, H, W) in zip((k1, k2), ((2, 16, 16), (2, 15, 15))):
        output, label = make_inputs(kk, B, H, W)
        total, (lr, lc, ls) = loss_fn(output, label)
        jax.block_until_ready(total)

        ref_total, (ref_lr, ref_lc, ref_ls) = _ref_ocr_loss(output, label,
                                                            COEFFS, NC)
        np.testing.assert_allclose(np.asarray(total), np.asarray(ref_total),
                                   rtol=1e-4, atol=1e-4)
        np.testing.assert_allclose(np.asarray(lr), np.asarray(ref_lr),
                                   rtol=1e-4, atol=1e-4)
        np.testing.assert_allclose(np.asarray(lc), np.asarray(ref_lc),
                                   rtol=1e-4, atol=1e-4)
        np.testing.assert_allclose(np.asarray(ls), np.asarray(ref_ls),
                                   rtol=1e-4, atol=1e-4)

    print("KERNEL_OK")
</pallas_src>

<mosaic_0001>
module attributes {stable_mosaic.version = 11 : i64} {
  func.func @_ocr_loss_kernel(%arg0: i32, %arg1: i32, %arg2: memref<2x20x2x128xf32, #tpu.memory_space<vmem>>, %arg3: memref<2x20x2x128xf32, #tpu.memory_space<vmem>>, %arg4: memref<1x8x128xf32, #tpu.memory_space<vmem>>, %arg5: memref<2x128xf32, #tpu.memory_space<vmem>>, %arg6: memref<2x128xf32, #tpu.memory_space<vmem>>, %arg7: memref<2x128xf32, #tpu.memory_space<vmem>>, %arg8: memref<2x128xf32, #tpu.memory_space<vmem>>, %arg9: memref<2x128xf32, #tpu.memory_space<vmem>>) attributes {dimension_semantics = [#tpu.dimension_semantics<parallel>, #tpu.dimension_semantics<arbitrary>], iteration_bounds = array<i64: 1, 1>, scalar_prefetch = 0 : i64, scratch_operands = 5 : i64, tpu.core_type = #tpu.core_type<tc>, window_params = [{transform_indices = @transform_0, window_bounds = array<i64: 2, 20, 2, 128>}, {transform_indices = @transform_1, window_bounds = array<i64: 2, 20, 2, 128>}, {transform_indices = @transform_2, window_bounds = array<i64: 1, 8, 128>}]} {
    %c0_i32 = arith.constant 0 : i32
    %0 = arith.cmpi eq, %arg1, %c0_i32 : i32
    %1 = arith.extui %0 : i1 to i32
    %c0_i32_0 = arith.constant 0 : i32
    %2 = arith.cmpi ne, %1, %c0_i32_0 : i32
    scf.if %2 {
      %cst_157 = arith.constant 0.000000e+00 : f32
      %352 = vector.broadcast %cst_157 : f32 to vector<2x128xf32>
      %c0_158 = arith.constant 0 : index
      %c0_159 = arith.constant 0 : index
      %353 = vector.load %arg5[%c0_158, %c0_159] : memref<2x128xf32, #tpu.memory_space<vmem>>, vector<2x128xf32>
      tpu.vector_store %arg5[%c0_158, %c0_159], %352 {strides = array<i32>} : memref<2x128xf32, #tpu.memory_space<vmem>>, vector<2x128xf32>,
      %c0_160 = arith.constant 0 : index
      %c0_161 = arith.constant 0 : index
      %354 = vector.load %arg6[%c0_160, %c0_161] : memref<2x128xf32, #tpu.memory_space<vmem>>, vector<2x128xf32>
      tpu.vector_store %arg6[%c0_160, %c0_161], %352 {strides = array<i32>} : memref<2x128xf32, #tpu.memory_space<vmem>>, vector<2x128xf32>,
      %c0_162 = arith.constant 0 : index
      %c0_163 = arith.constant 0 : index
      %355 = vector.load %arg7[%c0_162, %c0_163] : memref<2x128xf32, #tpu.memory_space<vmem>>, vector<2x128xf32>
      tpu.vector_store %arg7[%c0_162, %c0_163], %352 {strides = array<i32>} : memref<2x128xf32, #tpu.memory_space<vmem>>, vector<2x128xf32>,
      %c0_164 = arith.constant 0 : index
      %c0_165 = arith.constant 0 : index
      %356 = vector.load %arg8[%c0_164, %c0_165] : memref<2x128xf32, #tpu.memory_space<vmem>>, vector<2x128xf32>
      tpu.vector_store %arg8[%c0_164, %c0_165], %352 {strides = array<i32>} : memref<2x128xf32, #tpu.memory_space<vmem>>, vector<2x128xf32>,
      %c0_166 = arith.constant 0 : index
      %c0_167 = arith.constant 0 : index
      %357 = vector.load %arg9[%c0_166, %c0_167] : memref<2x128xf32, #tpu.memory_space<vmem>>, vector<2x128xf32>
      tpu.vector_store %arg9[%c0_166, %c0_167], %352 {strides = array<i32>} : memref<2x128xf32, #tpu.memory_space<vmem>>, vector<2x128xf32>,
    } else {
    }
    %c0 = arith.constant 0 : index
    %c0_1 = arith.constant 0 : index
    %c0_2 = arith.constant 0 : index
    %c0_3 = arith.constant 0 : index
    %3 = vector.load %arg2[%c0, %c0_1, %c0_2, %c0_3] : memref<2x20x2x128xf32, #tpu.memory_space<vmem>>, vector<2x20x2x128xf32>
    %c0_4 = arith.constant 0 : index
    %c0_5 = arith.constant 0 : index
    %c0_6 = arith.constant 0 : index
    %c0_7 = arith.constant 0 : index
    %4 = vector.load %arg3[%c0_4, %c0_5, %c0_6, %c0_7] : memref<2x20x2x128xf32, #tpu.memory_space<vmem>>, vector<2x20x2x128xf32>
    %5 = vector.extract_strided_slice %3 {offsets = [0, 0, 0, 0], sizes = [2, 1, 2, 128], strides = [1, 1, 1, 1]} : vector<2x20x2x128xf32> to vector<2x1x2x128xf32>
    %6 = vector.shape_cast %5 : vector<2x1x2x128xf32> to vector<2x2x128xf32>
    %7 = vector.extract_strided_slice %4 {offsets = [0, 0, 0, 0], sizes = [2, 1, 2, 128], strides = [1, 1, 1, 1]} : vector<2x20x2x128xf32> to vector<2x1x2x128xf32>
    %8 = vector.shape_cast %7 : vector<2x1x2x128xf32> to vector<2x2x128xf32>
    %9 = math.log %6 : vector<2x2x128xf32>
    %cst = arith.constant -1.000000e+02 : f32
    %10 = vector.broadcast %cst : f32 to vector<2x2x128xf32>
    %11 = arith.maximumf %9, %10 : vector<2x2x128xf32>
    %cst_8 = arith.constant 1.000000e+00 : f32
    %12 = vector.broadcast %cst_8 : f32 to vector<2x2x128xf32>
    %13 = arith.subf %12, %6 : vector<2x2x128xf32>
    %14 = math.log %13 : vector<2x2x128xf32>
    %cst_9 = arith.constant -1.000000e+02 : f32
    %15 = vector.broadcast %cst_9 : f32 to vector<2x2x128xf32>
    %16 = arith.maximumf %14, %15 : vector<2x2x128xf32>
    %17 = arith.mulf %8, %11 : vector<2x2x128xf32>
    %cst_10 = arith.constant 1.000000e+00 : f32
    %18 = vector.broadcast %cst_10 : f32 to vector<2x2x128xf32>
    %19 = arith.subf %18, %8 : vector<2x2x128xf32>
    %20 = arith.mulf %19, %16 : vector<2x2x128xf32>
    %21 = arith.addf %17, %20 : vector<2x2x128xf32>
    %cst_11 = arith.constant 0.000000e+00 : f32
    %22 = vector.broadcast %cst_11 : f32 to vector<2x2x128xf32>
    %23 = arith.subf %22, %21 : vector<2x2x128xf32>
    %cst_12 = arith.constant 5.000000e-01 : f32
    %24 = vector.broadcast %cst_12 : f32 to vector<2x2x128xf32>
    %25 = arith.cmpf olt, %8, %24 : vector<2x2x128xf32>
    %26 = arith.mulf %8, %23 : vector<2x2x128xf32>
    %cst_13 = arith.constant 0.000000e+00 : f32
    %27 = vector.broadcast %cst_13 : f32 to vector<2x2x128xf32>
    %28 = arith.select %25, %27, %26 : vector<2x2x128xi1>, vector<2x2x128xf32>
    %cst_14 = arith.constant 0.000000e+00 : f32
    %29 = vector.broadcast %cst_14 : f32 to vector<2x2x128xf32>
    %30 = arith.select %25, %23, %29 : vector<2x2x128xi1>, vector<2x2x128xf32>
    %31 = vector.extract_strided_slice %3 {offsets = [0, 1, 0, 0], sizes = [2, 1, 2, 128], strides = [1, 1, 1, 1]} : vector<2x20x2x128xf32> to vector<2x1x2x128xf32>
    %32 = vector.shape_cast %31 : vector<2x1x2x128xf32> to vector<2x2x128xf32>
    %33 = vector.extract_strided_slice %4 {offsets = [0, 1, 0, 0], sizes = [2, 1, 2, 128], strides = [1, 1, 1, 1]} : vector<2x20x2x128xf32> to vector<2x1x2x128xf32>
    %34 = vector.shape_cast %33 : vector<2x1x2x128xf32> to vector<2x2x128xf32>
    %35 = arith.subf %32, %34 : vector<2x2x128xf32>
    %36 = vector.extract_strided_slice %3 {offsets = [0, 2, 0, 0], sizes = [2, 1, 2, 128], strides = [1, 1, 1, 1]} : vector<2x20x2x128xf32> to vector<2x1x2x128xf32>
    %37 = vector.shape_cast %36 : vector<2x1x2x128xf32> to vector<2x2x128xf32>
    %38 = vector.extract_strided_slice %4 {offsets = [0, 2, 0, 0], sizes = [2, 1, 2, 128], strides = [1, 1, 1, 1]} : vector<2x20x2x128xf32> to vector<2x1x2x128xf32>
    %39 = vector.shape_cast %38 : vector<2x1x2x128xf32> to vector<2x2x128xf32>
    %40 = arith.subf %37, %39 : vector<2x2x128xf32>
    %41 = arith.mulf %35, %35 : vector<2x2x128xf32>
    %42 = arith.mulf %40, %40 : vector<2x2x128xf32>
    %43 = arith.addf %41, %42 : vector<2x2x128xf32>
    %44 = arith.mulf %8, %43 : vector<2x2x128xf32>
    %45 = vector.extract_strided_slice %3 {offsets = [0, 3, 0, 0], sizes = [2, 1, 2, 128], strides = [1, 1, 1, 1]} : vector<2x20x2x128xf32> to vector<2x1x2x128xf32>
    %46 = vector.shape_cast %45 : vector<2x1x2x128xf32> to vector<2x2x128xf32>
    %cst_15 = arith.constant 9.99999997E-7 : f32
    %47 = vector.broadcast %cst_15 : f32 to vector<2x2x128xf32>
    %48 = arith.addf %46, %47 : vector<2x2x128xf32>
    %49 = math.sqrt %48 : vector<2x2x128xf32>
    %50 = vector.extract_strided_slice %4 {offsets = [0, 3, 0, 0], sizes = [2, 1, 2, 128], strides = [1, 1, 1, 1]} : vector<2x20x2x128xf32> to vector<2x1x2x128xf32>
    %51 = vector.shape_cast %50 : vector<2x1x2x128xf32> to vector<2x2x128xf32>
    %cst_16 = arith.constant 9.99999997E-7 : f32
    %52 = vector.broadcast %cst_16 : f32 to vector<2x2x128xf32>
    %53 = arith.addf %51, %52 : vector<2x2x128xf32>
    %54 = math.sqrt %53 : vector<2x2x128xf32>
    %55 = arith.subf %49, %54 : vector<2x2x128xf32>
    %56 = vector.extract_strided_slice %3 {offsets = [0, 4, 0, 0], sizes = [2, 1, 2, 128], strides = [1, 1, 1, 1]} : vector<2x20x2x128xf32> to vector<2x1x2x128xf32>
    %57 = vector.shape_cast %56 : vector<2x1x2x128xf32> to vector<2x2x128xf32>
    %cst_17 = arith.constant 9.99999997E-7 : f32
    %58 = vector.broadcast %cst_17 : f32 to vector<2x2x128xf32>
    %59 = arith.addf %57, %58 : vector<2x2x128xf32>
    %60 = math.sqrt %59 : vector<2x2x128xf32>
    %61 = vector.extract_strided_slice %4 {offsets = [0, 4, 0, 0], sizes = [2, 1, 2, 128], strides = [1, 1, 1, 1]} : vector<2x20x2x128xf32> to vector<2x1x2x128xf32>
    %62 = vector.shape_cast %61 : vector<2x1x2x128xf32> to vector<2x2x128xf32>
    %cst_18 = arith.constant 9.99999997E-7 : f32
    %63 = vector.broadcast %cst_18 : f32 to vector<2x2x128xf32>
    %64 = arith.addf %62, %63 : vector<2x2x128xf32>
    %65 = math.sqrt %64 : vector<2x2x128xf32>
    %66 = arith.subf %60, %65 : vector<2x2x128xf32>
    %67 = arith.mulf %55, %55 : vector<2x2x128xf32>
    %68 = arith.mulf %66, %66 : vector<2x2x128xf32>
    %69 = arith.addf %67, %68 : vector<2x2x128xf32>
    %70 = arith.mulf %8, %69 : vector<2x2x128xf32>
    %c0_19 = arith.constant 0 : index
    %c0_20 = arith.constant 0 : index
    %71 = vector.load %arg5[%c0_19, %c0_20] : memref<2x128xf32, #tpu.memory_space<vmem>>, vector<2x128xf32>
    %cst_21 = arith.constant dense<0.000000e+00> : vector<2x128xf32>
    %72 = vector.multi_reduction <add>, %8, %cst_21 [0] : vector<2x2x128xf32> to vector<2x128xf32>
    %73 = arith.addf %71, %72 : vector<2x128xf32>
    %c0_22 = arith.constant 0 : index
    %c0_23 = arith.constant 0 : index
    %74 = vector.load %arg5[%c0_22, %c0_23] : memref<2x128xf32, #tpu.memory_space<vmem>>, vector<2x128xf32>
    tpu.vector_store %arg5[%c0_22, %c0_23], %73 {strides = array<i32>} : memref<2x128xf32, #tpu.memory_space<vmem>>, vector<2x128xf32>,
    %c0_24 = arith.constant 0 : index
    %c0_25 = arith.constant 0 : index
    %75 = vector.load %arg6[%c0_24, %c0_25] : memref<2x128xf32, #tpu.memory_space<vmem>>, vector<2x128xf32>
    %cst_26 = arith.constant dense<0.000000e+00> : vector<2x128xf32>
    %76 = vector.multi_reduction <add>, %28, %cst_26 [0] : vector<2x2x128xf32> to vector<2x128xf32>
    %77 = arith.addf %75, %76 : vector<2x128xf32>
    %c0_27 = arith.constant 0 : index
    %c0_28 = arith.constant 0 : index
    %78 = vector.load %arg6[%c0_27, %c0_28] : memref<2x128xf32, #tpu.memory_space<vmem>>, vector<2x128xf32>
    tpu.vector_store %arg6[%c0_27, %c0_28], %77 {strides = array<i32>} : memref<2x128xf32, #tpu.memory_space<vmem>>, vector<2x128xf32>,
    %c0_29 = arith.constant 0 : index
    %c0_30 = arith.constant 0 : index
    %79 = vector.load %arg7[%c0_29, %c0_30] : memref<2x128xf32, #tpu.memory_space<vmem>>, vector<2x128xf32>
    %cst_31 = arith.constant dense<0.000000e+00> : vector<2x128xf32>
    %80 = vector.multi_reduction <add>, %30, %cst_31 [0] : vector<2x2x128xf32> to vector<2x128xf32>
    %81 = arith.addf %79, %80 : vector<2x128xf32>
    %c0_32 = arith.constant 0 : index
    %c0_33 = arith.constant 0 : index
    %82 = vector.load %arg7[%c0_32, %c0_33] : memref<2x128xf32, #tpu.memory_space<vmem>>, vector<2x128xf32>
    tpu.vector_store %arg7[%c0_32, %c0_33], %81 {strides = array<i32>} : memref<2x128xf32, #tpu.memory_space<vmem>>, vector<2x128xf32>,
    %c0_34 = arith.constant 0 : index
    %c0_35 = arith.constant 0 : index
    %83 = vector.load %arg8[%c0_34, %c0_35] : memref<2x128xf32, #tpu.memory_space<vmem>>, vector<2x128xf32>
    %cst_36 = arith.constant dense<0.000000e+00> : vector<2x128xf32>
    %84 = vector.multi_reduction <add>, %44, %cst_36 [0] : vector<2x2x128xf32> to vector<2x128xf32>
    %85 = arith.addf %83, %84 : vector<2x128xf32>
    %c0_37 = arith.constant 0 : index
    %c0_38 = arith.constant 0 : index
    %86 = vector.load %arg8[%c0_37, %c0_38] : memref<2x128xf32, #tpu.memory_space<vmem>>, vector<2x128xf32>
    tpu.vector_store %arg8[%c0_37, %c0_38], %85 {strides = array<i32>} : memref<2x128xf32, #tpu.memory_space<vmem>>, vector<2x128xf32>,
    %c0_39 = arith.constant 0 : index
    %c0_40 = arith.constant 0 : index
    %87 = vector.load %arg9[%c0_39, %c0_40] : memref<2x128xf32, #tpu.memory_space<vmem>>, vector<2x128xf32>
    %cst_41 = arith.constant dense<0.000000e+00> : vector<2x128xf32>
    %88 = vector.multi_reduction <add>, %70, %cst_41 [0] : vector<2x2x128xf32> to vector<2x128xf32>
    %89 = arith.addf %87, %88 : vector<2x128xf32>
    %c0_42 = arith.constant 0 : index
    %c0_43 = arith.constant 0 : index
    %90 = vector.load %arg9[%c0_42, %c0_43] : memref<2x128xf32, #tpu.memory_space<vmem>>, vector<2x128xf32>
    tpu.vector_store %arg9[%c0_42, %c0_43], %89 {strides = array<i32>} : memref<2x128xf32, #tpu.memory_space<vmem>>, vector<2x128xf32>,
    %91 = vector.extract_strided_slice %3 {offsets = [0, 5, 0, 0], sizes = [2, 1, 2, 128], strides = [1, 1, 1, 1]} : vector<2x20x2x128xf32> to vector<2x1x2x128xf32>
    %92 = vector.shape_cast %91 : vector<2x1x2x128xf32> to vector<2x2x128xf32>
    %93 = vector.extract_strided_slice %4 {offsets = [0, 5, 0, 0], sizes = [2, 1, 2, 128], strides = [1, 1, 1, 1]} : vector<2x20x2x128xf32> to vector<2x1x2x128xf32>
    %94 = vector.shape_cast %93 : vector<2x1x2x128xf32> to vector<2x2x128xf32>
    %95 = math.log %92 : vector<2x2x128xf32>
    %cst_44 = arith.constant -1.000000e+02 : f32
    %96 = vector.broadcast %cst_44 : f32 to vector<2x2x128xf32>
    %97 = arith.maximumf %95, %96 : vector<2x2x128xf32>
    %cst_45 = arith.constant 1.000000e+00 : f32
    %98 = vector.broadcast %cst_45 : f32 to vector<2x2x128xf32>
    %99 = arith.subf %98, %92 : vector<2x2x128xf32>
    %100 = math.log %99 : vector<2x2x128xf32>
    %cst_46 = arith.constant -1.000000e+02 : f32
    %101 = vector.broadcast %cst_46 : f32 to vector<2x2x128xf32>
    %102 = arith.maximumf %100, %101 : vector<2x2x128xf32>
    %103 = arith.mulf %94, %97 : vector<2x2x128xf32>
    %cst_47 = arith.constant 1.000000e+00 : f32
    %104 = vector.broadcast %cst_47 : f32 to vector<2x2x128xf32>
    %105 = arith.subf %104, %94 : vector<2x2x128xf32>
    %106 = arith.mulf %105, %102 : vector<2x2x128xf32>
    %107 = arith.addf %103, %106 : vector<2x2x128xf32>
    %cst_48 = arith.constant 0.000000e+00 : f32
    %108 = vector.broadcast %cst_48 : f32 to vector<2x2x128xf32>
    %109 = arith.subf %108, %107 : vector<2x2x128xf32>
    %cst_49 = arith.constant 5.000000e-01 : f32
    %110 = vector.broadcast %cst_49 : f32 to vector<2x2x128xf32>
    %111 = arith.cmpf olt, %94, %110 : vector<2x2x128xf32>
    %112 = arith.mulf %94, %109 : vector<2x2x128xf32>
    %cst_50 = arith.constant 0.000000e+00 : f32
    %113 = vector.broadcast %cst_50 : f32 to vector<2x2x128xf32>
    %114 = arith.select %111, %113, %112 : vector<2x2x128xi1>, vector<2x2x128xf32>
    %cst_51 = arith.constant 0.000000e+00 : f32
    %115 = vector.broadcast %cst_51 : f32 to vector<2x2x128xf32>
    %116 = arith.select %111, %109, %115 : vector<2x2x128xi1>, vector<2x2x128xf32>
    %117 = vector.extract_strided_slice %3 {offsets = [0, 6, 0, 0], sizes = [2, 1, 2, 128], strides = [1, 1, 1, 1]} : vector<2x20x2x128xf32> to vector<2x1x2x128xf32>
    %118 = vector.shape_cast %117 : vector<2x1x2x128xf32> to vector<2x2x128xf32>
    %119 = vector.extract_strided_slice %4 {offsets = [0, 6, 0, 0], sizes = [2, 1, 2, 128], strides = [1, 1, 1, 1]} : vector<2x20x2x128xf32> to vector<2x1x2x128xf32>
    %120 = vector.shape_cast %119 : vector<2x1x2x128xf32> to vector<2x2x128xf32>
    %121 = arith.subf %118, %120 : vector<2x2x128xf32>
    %122 = vector.extract_strided_slice %3 {offsets = [0, 7, 0, 0], sizes = [2, 1, 2, 128], strides = [1, 1, 1, 1]} : vector<2x20x2x128xf32> to vector<2x1x2x128xf32>
    %123 = vector.shape_cast %122 : vector<2x1x2x128xf32> to vector<2x2x128xf32>
    %124 = vector.extract_strided_slice %4 {offsets = [0, 7, 0, 0], sizes = [2, 1, 2, 128], strides = [1, 1, 1, 1]} : vector<2x20x2x128xf32> to vector<2x1x2x128xf32>
    %125 = vector.shape_cast %124 : vector<2x1x2x128xf32> to vector<2x2x128xf32>
    %126 = arith.subf %123, %125 : vector<2x2x128xf32>
    %127 = arith.mulf %121, %121 : vector<2x2x128xf32>
    %128 = arith.mulf %126, %126 : vector<2x2x128xf32>
    %129 = arith.addf %127, %128 : vector<2x2x128xf32>
    %130 = arith.mulf %94, %129 : vector<2x2x128xf32>
    %131 = vector.extract_strided_slice %3 {offsets = [0, 8, 0, 0], sizes = [2, 1, 2, 128], strides = [1, 1, 1, 1]} : vector<2x20x2x128xf32> to vector<2x1x2x128xf32>
    %132 = vector.shape_cast %131 : vector<2x1x2x128xf32> to vector<2x2x128xf32>
    %cst_52 = arith.constant 9.99999997E-7 : f32
    %133 = vector.broadcast %cst_52 : f32 to vector<2x2x128xf32>
    %134 = arith.addf %132, %133 : vector<2x2x128xf32>
    %135 = math.sqrt %134 : vector<2x2x128xf32>
    %136 = vector.extract_strided_slice %4 {offsets = [0, 8, 0, 0], sizes = [2, 1, 2, 128], strides = [1, 1, 1, 1]} : vector<2x20x2x128xf32> to vector<2x1x2x128xf32>
    %137 = vector.shape_cast %136 : vector<2x1x2x128xf32> to vector<2x2x128xf32>
    %cst_53 = arith.constant 9.99999997E-7 : f32
    %138 = vector.broadcast %cst_53 : f32 to vector<2x2x128xf32>
    %139 = arith.addf %137, %138 : vector<2x2x128xf32>
    %140 = math.sqrt %139 : vector<2x2x128xf32>
    %141 = arith.subf %135, %140 : vector<2x2x128xf32>
    %142 = vector.extract_strided_slice %3 {offsets = [0, 9, 0, 0], sizes = [2, 1, 2, 128], strides = [1, 1, 1, 1]} : vector<2x20x2x128xf32> to vector<2x1x2x128xf32>
    %143 = vector.shape_cast %142 : vector<2x1x2x128xf32> to vector<2x2x128xf32>
    %cst_54 = arith.constant 9.99999997E-7 : f32
    %144 = vector.broadcast %cst_54 : f32 to vector<2x2x128xf32>
    %145 = arith.addf %143, %144 : vector<2x2x128xf32>
    %146 = math.sqrt %145 : vector<2x2x128xf32>
    %147 = vector.extract_strided_slice %4 {offsets = [0, 9, 0, 0], sizes = [2, 1, 2, 128], strides = [1, 1, 1, 1]} : vector<2x20x2x128xf32> to vector<2x1x2x128xf32>
    %148 = vector.shape_cast %147 : vector<2x1x2x128xf32> to vector<2x2x128xf32>
    %cst_55 = arith.constant 9.99999997E-7 : f32
    %149 = vector.broadcast %cst_55 : f32 to vector<2x2x128xf32>
    %150 = arith.addf %148, %149 : vector<2x2x128xf32>
    %151 = math.sqrt %150 : vector<2x2x128xf32>
    %152 = arith.subf %146, %151 : vector<2x2x128xf32>
    %153 = arith.mulf %141, %141 : vector<2x2x128xf32>
    %154 = arith.mulf %152, %152 : vector<2x2x128xf32>
    %155 = arith.addf %153, %154 : vector<2x2x128xf32>
    %156 = arith.mulf %94, %155 : vector<2x2x128xf32>
    %c0_56 = arith.constant 0 : index
    %c0_57 = arith.constant 0 : index
    %157 = vector.load %arg5[%c0_56, %c0_57] : memref<2x128xf32, #tpu.memory_space<vmem>>, vector<2x128xf32>
    %cst_58 = arith.constant dense<0.000000e+00> : vector<2x128xf32>
    %158 = vector.multi_reduction <add>, %94, %cst_58 [0] : vector<2x2x128xf32> to vector<2x128xf32>
    %159 = arith.addf %157, %158 : vector<2x128xf32>
    %c0_59 = arith.constant 0 : index
    %c0_60 = arith.constant 0 : index
    %160 = vector.load %arg5[%c0_59, %c0_60] : memref<2x128xf32, #tpu.memory_space<vmem>>, vector<2x128xf32>
    tpu.vector_store %arg5[%c0_59, %c0_60], %159 {strides = array<i32>} : memref<2x128xf32, #tpu.memory_space<vmem>>, vector<2x128xf32>,
    %c0_61 = arith.constant 0 : index
    %c0_62 = arith.constant 0 : index
    %161 = vector.load %arg6[%c0_61, %c0_62] : memref<2x128xf32, #tpu.memory_space<vmem>>, vector<2x128xf32>
    %cst_63 = arith.constant dense<0.000000e+00> : vector<2x128xf32>
    %162 = vector.multi_reduction <add>, %114, %cst_63 [0] : vector<2x2x128xf32> to vector<2x128xf32>
    %163 = arith.addf %161, %162 : vector<2x128xf32>
    %c0_64 = arith.constant 0 : index
    %c0_65 = arith.constant 0 : index
    %164 = vector.load %arg6[%c0_64, %c0_65] : memref<2x128xf32, #tpu.memory_space<vmem>>, vector<2x128xf32>
    tpu.vector_store %arg6[%c0_64, %c0_65], %163 {strides = array<i32>} : memref<2x128xf32, #tpu.memory_space<vmem>>, vector<2x128xf32>,
    %c0_66 = arith.constant 0 : index
    %c0_67 = arith.constant 0 : index
    %165 = vector.load %arg7[%c0_66, %c0_67] : memref<2x128xf32, #tpu.memory_space<vmem>>, vector<2x128xf32>
    %cst_68 = arith.constant dense<0.000000e+00> : vector<2x128xf32>
    %166 = vector.multi_reduction <add>, %116, %cst_68 [0] : vector<2x2x128xf32> to vector<2x128xf32>
    %167 = arith.addf %165, %166 : vector<2x128xf32>
    %c0_69 = arith.constant 0 : index
    %c0_70 = arith.constant 0 : index
    %168 = vector.load %arg7[%c0_69, %c0_70] : memref<2x128xf32, #tpu.memory_space<vmem>>, vector<2x128xf32>
    tpu.vector_store %arg7[%c0_69, %c0_70], %167 {strides = array<i32>} : memref<2x128xf32, #tpu.memory_space<vmem>>, vector<2x128xf32>,
    %c0_71 = arith.constant 0 : index
    %c0_72 = arith.constant 0 : index
    %169 = vector.load %arg8[%c0_71, %c0_72] : memref<2x128xf32, #tpu.memory_space<vmem>>, vector<2x128xf32>
    %cst_73 = arith.constant dense<0.000000e+00> : vector<2x128xf32>
    %170 = vector.multi_reduction <add>, %130, %cst_73 [0] : vector<2x2x128xf32> to vector<2x128xf32>
    %171 = arith.addf %169, %170 : vector<2x128xf32>
    %c0_74 = arith.constant 0 : index
    %c0_75 = arith.constant 0 : index
    %172 = vector.load %arg8[%c0_74, %c0_75] : memref<2x128xf32, #tpu.memory_space<vmem>>, vector<2x128xf32>
    tpu.vector_store %arg8[%c0_74, %c0_75], %171 {strides = array<i32>} : memref<2x128xf32, #tpu.memory_space<vmem>>, vector<2x128xf32>,
    %c0_76 = arith.constant 0 : index
    %c0_77 = arith.constant 0 : index
    %173 = vector.load %arg9[%c0_76, %c0_77] : memref<2x128xf32, #tpu.memory_space<vmem>>, vector<2x128xf32>
    %cst_78 = arith.constant dense<0.000000e+00> : vector<2x128xf32>
    %174 = vector.multi_reduction <add>, %156, %cst_78 [0] : vector<2x2x128xf32> to vector<2x128xf32>
    %175 = arith.addf %173, %174 : vector<2x128xf32>
    %c0_79 = arith.constant 0 : index
    %c0_80 = arith.constant 0 : index
    %176 = vector.load %arg9[%c0_79, %c0_80] : memref<2x128xf32, #tpu.memory_space<vmem>>, vector<2x128xf32>
    tpu.vector_store %arg9[%c0_79, %c0_80], %175 {strides = array<i32>} : memref<2x128xf32, #tpu.memory_space<vmem>>, vector<2x128xf32>,
    %177 = vector.extract_strided_slice %3 {offsets = [0, 10, 0, 0], sizes = [2, 1, 2, 128], strides = [1, 1, 1, 1]} : vector<2x20x2x128xf32> to vector<2x1x2x128xf32>
    %178 = vector.shape_cast %177 : vector<2x1x2x128xf32> to vector<2x2x128xf32>
    %179 = vector.extract_strided_slice %4 {offsets = [0, 10, 0, 0], sizes = [2, 1, 2, 128], strides = [1, 1, 1, 1]} : vector<2x20x2x128xf32> to vector<2x1x2x128xf32>
    %180 = vector.shape_cast %179 : vector<2x1x2x128xf32> to vector<2x2x128xf32>
    %181 = math.log %178 : vector<2x2x128xf32>
    %cst_81 = arith.constant -1.000000e+02 : f32
    %182 = vector.broadcast %cst_81 : f32 to vector<2x2x128xf32>
    %183 = arith.maximumf %181, %182 : vector<2x2x128xf32>
    %cst_82 = arith.constant 1.000000e+00 : f32
    %184 = vector.broadcast %cst_82 : f32 to vector<2x2x128xf32>
    %185 = arith.subf %184, %178 : vector<2x2x128xf32>
    %186 = math.log %185 : vector<2x2x128xf32>
    %cst_83 = arith.constant -1.000000e+02 : f32
    %187 = vector.broadcast %cst_83 : f32 to vector<2x2x128xf32>
    %188 = arith.maximumf %186, %187 : vector<2x2x128xf32>
    %189 = arith.mulf %180, %183 : vector<2x2x128xf32>
    %cst_84 = arith.constant 1.000000e+00 : f32
    %190 = vector.broadcast %cst_84 : f32 to vector<2x2x128xf32>
    %191 = arith.subf %190, %180 : vector<2x2x128xf32>
    %192 = arith.mulf %191, %188 : vector<2x2x128xf32>
    %193 = arith.addf %189, %192 : vector<2x2x128xf32>
    %cst_85 = arith.constant 0.000000e+00 : f32
    %194 = vector.broadcast %cst_85 : f32 to vector<2x2x128xf32>
    %195 = arith.subf %194, %193 : vector<2x2x128xf32>
    %cst_86 = arith.constant 5.000000e-01 : f32
    %196 = vector.broadcast %cst_86 : f32 to vector<2x2x128xf32>
    %197 = arith.cmpf olt, %180, %196 : vector<2x2x128xf32>
    %198 = arith.mulf %180, %195 : vector<2x2x128xf32>
    %cst_87 = arith.constant 0.000000e+00 : f32
    %199 = vector.broadcast %cst_87 : f32 to vector<2x2x128xf32>
    %200 = arith.select %197, %199, %198 : vector<2x2x128xi1>, vector<2x2x128xf32>
    %cst_88 = arith.constant 0.000000e+00 : f32
    %201 = vector.broadcast %cst_88 : f32 to vector<2x2x128xf32>
    %202 = arith.select %197, %195, %201 : vector<2x2x128xi1>, vector<2x2x128xf32>
    %203 = vector.extract_strided_slice %3 {offsets = [0, 11, 0, 0], sizes = [2, 1, 2, 128], strides = [1, 1, 1, 1]} : vector<2x20x2x128xf32> to vector<2x1x2x128xf32>
    %204 = vector.shape_cast %203 : vector<2x1x2x128xf32> to vector<2x2x128xf32>
    %205 = vector.extract_strided_slice %4 {offsets = [0, 11, 0, 0], sizes = [2, 1, 2, 128], strides = [1, 1, 1, 1]} : vector<2x20x2x128xf32> to vector<2x1x2x128xf32>
    %206 = vector.shape_cast %205 : vector<2x1x2x128xf32> to vector<2x2x128xf32>
    %207 = arith.subf %204, %206 : vector<2x2x128xf32>
    %208 = vector.extract_strided_slice %3 {offsets = [0, 12, 0, 0], sizes = [2, 1, 2, 128], strides = [1, 1, 1, 1]} : vector<2x20x2x128xf32> to vector<2x1x2x128xf32>
    %209 = vector.shape_cast %208 : vector<2x1x2x128xf32> to vector<2x2x128xf32>
    %210 = vector.extract_strided_slice %4 {offsets = [0, 12, 0, 0], sizes = [2, 1, 2, 128], strides = [1, 1, 1, 1]} : vector<2x20x2x128xf32> to vector<2x1x2x128xf32>
    %211 = vector.shape_cast %210 : vector<2x1x2x128xf32> to vector<2x2x128xf32>
    %212 = arith.subf %209, %211 : vector<2x2x128xf32>
    %213 = arith.mulf %207, %207 : vector<2x2x128xf32>
    %214 = arith.mulf %212, %212 : vector<2x2x128xf32>
    %215 = arith.addf %213, %214 : vector<2x2x128xf32>
    %216 = arith.mulf %180, %215 : vector<2x2x128xf32>
    %217 = vector.extract_strided_slice %3 {offsets = [0, 13, 0, 0], sizes = [2, 1, 2, 128], strides = [1, 1, 1, 1]} : vector<2x20x2x128xf32> to vector<2x1x2x128xf32>
    %218 = vector.shape_cast %217 : vector<2x1x2x128xf32> to vector<2x2x128xf32>
    %cst_89 = arith.constant 9.99999997E-7 : f32
    %219 = vector.broadcast %cst_89 : f32 to vector<2x2x128xf32>
    %220 = arith.addf %218, %219 : vector<2x2x128xf32>
    %221 = math.sqrt %220 : vector<2x2x128xf32>
    %222 = vector.extract_strided_slice %4 {offsets = [0, 13, 0, 0], sizes = [2, 1, 2, 128], strides = [1, 1, 1, 1]} : vector<2x20x2x128xf32> to vector<2x1x2x128xf32>
    %223 = vector.shape_cast %222 : vector<2x1x2x128xf32> to vector<2x2x128xf32>
    %cst_90 = arith.constant 9.99999997E-7 : f32
    %224 = vector.broadcast %cst_90 : f32 to vector<2x2x128xf32>
    %225 = arith.addf %223, %224 : vector<2x2x128xf32>
    %226 = math.sqrt %225 : vector<2x2x128xf32>
    %227 = arith.subf %221, %226 : vector<2x2x128xf32>
    %228 = vector.extract_strided_slice %3 {offsets = [0, 14, 0, 0], sizes = [2, 1, 2, 128], strides = [1, 1, 1, 1]} : vector<2x20x2x128xf32> to vector<2x1x2x128xf32>
    %229 = vector.shape_cast %228 : vector<2x1x2x128xf32> to vector<2x2x128xf32>
    %cst_91 = arith.constant 9.99999997E-7 : f32
    %230 = vector.broadcast %cst_91 : f32 to vector<2x2x128xf32>
    %231 = arith.addf %229, %230 : vector<2x2x128xf32>
    %232 = math.sqrt %231 : vector<2x2x128xf32>
    %233 = vector.extract_strided_slice %4 {offsets = [0, 14, 0, 0], sizes = [2, 1, 2, 128], strides = [1, 1, 1, 1]} : vector<2x20x2x128xf32> to vector<2x1x2x128xf32>
    %234 = vector.shape_cast %233 : vector<2x1x2x128xf32> to vector<2x2x128xf32>
    %cst_92 = arith.constant 9.99999997E-7 : f32
    %235 = vector.broadcast %cst_92 : f32 to vector<2x2x128xf32>
    %236 = arith.addf %234, %235 : vector<2x2x128xf32>
    %237 = math.sqrt %236 : vector<2x2x128xf32>
    %238 = arith.subf %232, %237 : vector<2x2x128xf32>
    %239 = arith.mulf %227, %227 : vector<2x2x128xf32>
    %240 = arith.mulf %238, %238 : vector<2x2x128xf32>
    %241 = arith.addf %239, %240 : vector<2x2x128xf32>
    %242 = arith.mulf %180, %241 : vector<2x2x128xf32>
    %c0_93 = arith.constant 0 : index
    %c0_94 = arith.constant 0 : index
    %243 = vector.load %arg5[%c0_93, %c0_94] : memref<2x128xf32, #tpu.memory_space<vmem>>, vector<2x128xf32>
    %cst_95 = arith.constant dense<0.000000e+00> : vector<2x128xf32>
    %244 = vector.multi_reduction <add>, %180, %cst_95 [0] : vector<2x2x128xf32> to vector<2x128xf32>
    %245 = arith.addf %243, %244 : vector<2x128xf32>
    %c0_96 = arith.constant 0 : index
    %c0_97 = arith.constant 0 : index
    %246 = vector.load %arg5[%c0_96, %c0_97] : memref<2x128xf32, #tpu.memory_space<vmem>>, vector<2x128xf32>
    tpu.vector_store %arg5[%c0_96, %c0_97], %245 {strides = array<i32>} : memref<2x128xf32, #tpu.memory_space<vmem>>, vector<2x128xf32>,
    %c0_98 = arith.constant 0 : index
    %c0_99 = arith.constant 0 : index
    %247 = vector.load %arg6[%c0_98, %c0_99] : memref<2x128xf32, #tpu.memory_space<vmem>>, vector<2x128xf32>
    %cst_100 = arith.constant dense<0.000000e+00> : vector<2x128xf32>
    %248 = vector.multi_reduction <add>, %200, %cst_100 [0] : vector<2x2x128xf32> to vector<2x128xf32>
    %249 = arith.addf %247, %248 : vector<2x128xf32>
    %c0_101 = arith.constant 0 : index
    %c0_102 = arith.constant 0 : index
    %250 = vector.load %arg6[%c0_101, %c0_102] : memref<2x128xf32, #tpu.memory_space<vmem>>, vector<2x128xf32>
    tpu.vector_store %arg6[%c0_101, %c0_102], %249 {strides = array<i32>} : memref<2x128xf32, #tpu.memory_space<vmem>>, vector<2x128xf32>,
    %c0_103 = arith.constant 0 : index
    %c0_104 = arith.constant 0 : index
    %251 = vector.load %arg7[%c0_103, %c0_104] : memref<2x128xf32, #tpu.memory_space<vmem>>, vector<2x128xf32>
    %cst_105 = arith.constant dense<0.000000e+00> : vector<2x128xf32>
    %252 = vector.multi_reduction <add>, %202, %cst_105 [0] : vector<2x2x128xf32> to vector<2x128xf32>
    %253 = arith.addf %251, %252 : vector<2x128xf32>
    %c0_106 = arith.constant 0 : index
    %c0_107 = arith.constant 0 : index
    %254 = vector.load %arg7[%c0_106, %c0_107] : memref<2x128xf32, #tpu.memory_space<vmem>>, vector<2x128xf32>
    tpu.vector_store %arg7[%c0_106, %c0_107], %253 {strides = array<i32>} : memref<2x128xf32, #tpu.memory_space<vmem>>, vector<2x128xf32>,
    %c0_108 = arith.constant 0 : index
    %c0_109 = arith.constant 0 : index
    %255 = vector.load %arg8[%c0_108, %c0_109] : memref<2x128xf32, #tpu.memory_space<vmem>>, vector<2x128xf32>
    %cst_110 = arith.constant dense<0.000000e+00> : vector<2x128xf32>
    %256 = vector.multi_reduction <add>, %216, %cst_110 [0] : vector<2x2x128xf32> to vector<2x128xf32>
    %257 = arith.addf %255, %256 : vector<2x128xf32>
    %c0_111 = arith.constant 0 : index
    %c0_112 = arith.constant 0 : index
    %258 = vector.load %arg8[%c0_111, %c0_112] : memref<2x128xf32, #tpu.memory_space<vmem>>, vector<2x128xf32>
    tpu.vector_store %arg8[%c0_111, %c0_112], %257 {strides = array<i32>} : memref<2x128xf32, #tpu.memory_space<vmem>>, vector<2x128xf32>,
    %c0_113 = arith.constant 0 : index
    %c0_114 = arith.constant 0 : index
    %259 = vector.load %arg9[%c0_113, %c0_114] : memref<2x128xf32, #tpu.memory_space<vmem>>, vector<2x128xf32>
    %cst_115 = arith.constant dense<0.000000e+00> : vector<2x128xf32>
    %260 = vector.multi_reduction <add>, %242, %cst_115 [0] : vector<2x2x128xf32> to vector<2x128xf32>
    %261 = arith.addf %259, %260 : vector<2x128xf32>
    %c0_116 = arith.constant 0 : index
    %c0_117 = arith.constant 0 : index
    %262 = vector.load %arg9[%c0_116, %c0_117] : memref<2x128xf32, #tpu.memory_space<vmem>>, vector<2x128xf32>
    tpu.vector_store %arg9[%c0_116, %c0_117], %261 {strides = array<i32>} : memref<2x128xf32, #tpu.memory_space<vmem>>, vector<2x128xf32>,
    %263 = vector.extract_strided_slice %3 {offsets = [0, 15, 0, 0], sizes = [2, 1, 2, 128], strides = [1, 1, 1, 1]} : vector<2x20x2x128xf32> to vector<2x1x2x128xf32>
    %264 = vector.shape_cast %263 : vector<2x1x2x128xf32> to vector<2x2x128xf32>
    %265 = vector.extract_strided_slice %4 {offsets = [0, 15, 0, 0], sizes = [2, 1, 2, 128], strides = [1, 1, 1, 1]} : vector<2x20x2x128xf32> to vector<2x1x2x128xf32>
    %266 = vector.shape_cast %265 : vector<2x1x2x128xf32> to vector<2x2x128xf32>
    %267 = math.log %264 : vector<2x2x128xf32>
    %cst_118 = arith.constant -1.000000e+02 : f32
    %268 = vector.broadcast %cst_118 : f32 to vector<2x2x128xf32>
    %269 = arith.maximumf %267, %268 : vector<2x2x128xf32>
    %cst_119 = arith.constant 1.000000e+00 : f32
    %270 = vector.broadcast %cst_119 : f32 to vector<2x2x128xf32>
    %271 = arith.subf %270, %264 : vector<2x2x128xf32>
    %272 = math.log %271 : vector<2x2x128xf32>
    %cst_120 = arith.constant -1.000000e+02 : f32
    %273 = vector.broadcast %cst_120 : f32 to vector<2x2x128xf32>
    %274 = arith.maximumf %272, %273 : vector<2x2x128xf32>
    %275 = arith.mulf %266, %269 : vector<2x2x128xf32>
    %cst_121 = arith.constant 1.000000e+00 : f32
    %276 = vector.broadcast %cst_121 : f32 to vector<2x2x128xf32>
    %277 = arith.subf %276, %266 : vector<2x2x128xf32>
    %278 = arith.mulf %277, %274 : vector<2x2x128xf32>
    %279 = arith.addf %275, %278 : vector<2x2x128xf32>
    %cst_122 = arith.constant 0.000000e+00 : f32
    %280 = vector.broadcast %cst_122 : f32 to vector<2x2x128xf32>
    %281 = arith.subf %280, %279 : vector<2x2x128xf32>
    %cst_123 = arith.constant 5.000000e-01 : f32
    %282 = vector.broadcast %cst_123 : f32 to vector<2x2x128xf32>
    %283 = arith.cmpf olt, %266, %282 : vector<2x2x128xf32>
    %284 = arith.mulf %266, %281 : vector<2x2x128xf32>
    %cst_124 = arith.constant 0.000000e+00 : f32
    %285 = vector.broadcast %cst_124 : f32 to vector<2x2x128xf32>
    %286 = arith.select %283, %285, %284 : vector<2x2x128xi1>, vector<2x2x128xf32>
    %cst_125 = arith.constant 0.000000e+00 : f32
    %287 = vector.broadcast %cst_125 : f32 to vector<2x2x128xf32>
    %288 = arith.select %283, %281, %287 : vector<2x2x128xi1>, vector<2x2x128xf32>
    %289 = vector.extract_strided_slice %3 {offsets = [0, 16, 0, 0], sizes = [2, 1, 2, 128], strides = [1, 1, 1, 1]} : vector<2x20x2x128xf32> to vector<2x1x2x128xf32>
    %290 = vector.shape_cast %289 : vector<2x1x2x128xf32> to vector<2x2x128xf32>
    %291 = vector.extract_strided_slice %4 {offsets = [0, 16, 0, 0], sizes = [2, 1, 2, 128], strides = [1, 1, 1, 1]} : vector<2x20x2x128xf32> to vector<2x1x2x128xf32>
    %292 = vector.shape_cast %291 : vector<2x1x2x128xf32> to vector<2x2x128xf32>
    %293 = arith.subf %290, %292 : vector<2x2x128xf32>
    %294 = vector.extract_strided_slice %3 {offsets = [0, 17, 0, 0], sizes = [2, 1, 2, 128], strides = [1, 1, 1, 1]} : vector<2x20x2x128xf32> to vector<2x1x2x128xf32>
    %295 = vector.shape_cast %294 : vector<2x1x2x128xf32> to vector<2x2x128xf32>
    %296 = vector.extract_strided_slice %4 {offsets = [0, 17, 0, 0], sizes = [2, 1, 2, 128], strides = [1, 1, 1, 1]} : vector<2x20x2x128xf32> to vector<2x1x2x128xf32>
    %297 = vector.shape_cast %296 : vector<2x1x2x128xf32> to vector<2x2x128xf32>
    %298 = arith.subf %295, %297 : vector<2x2x128xf32>
    %299 = arith.mulf %293, %293 : vector<2x2x128xf32>
    %300 = arith.mulf %298, %298 : vector<2x2x128xf32>
    %301 = arith.addf %299, %300 : vector<2x2x128xf32>
    %302 = arith.mulf %266, %301 : vector<2x2x128xf32>
    %303 = vector.extract_strided_slice %3 {offsets = [0, 18, 0, 0], sizes = [2, 1, 2, 128], strides = [1, 1, 1, 1]} : vector<2x20x2x128xf32> to vector<2x1x2x128xf32>
    %304 = vector.shape_cast %303 : vector<2x1x2x128xf32> to vector<2x2x128xf32>
    %cst_126 = arith.constant 9.99999997E-7 : f32
    %305 = vector.broadcast %cst_126 : f32 to vector<2x2x128xf32>
    %306 = arith.addf %304, %305 : vector<2x2x128xf32>
    %307 = math.sqrt %306 : vector<2x2x128xf32>
    %308 = vector.extract_strided_slice %4 {offsets = [0, 18, 0, 0], sizes = [2, 1, 2, 128], strides = [1, 1, 1, 1]} : vector<2x20x2x128xf32> to vector<2x1x2x128xf32>
    %309 = vector.shape_cast %308 : vector<2x1x2x128xf32> to vector<2x2x128xf32>
    %cst_127 = arith.constant 9.99999997E-7 : f32
    %310 = vector.broadcast %cst_127 : f32 to vector<2x2x128xf32>
    %311 = arith.addf %309, %310 : vector<2x2x128xf32>
    %312 = math.sqrt %311 : vector<2x2x128xf32>
    %313 = arith.subf %307, %312 : vector<2x2x128xf32>
    %314 = vector.extract_strided_slice %3 {offsets = [0, 19, 0, 0], sizes = [2, 1, 2, 128], strides = [1, 1, 1, 1]} : vector<2x20x2x128xf32> to vector<2x1x2x128xf32>
    %315 = vector.shape_cast %314 : vector<2x1x2x128xf32> to vector<2x2x128xf32>
    %cst_128 = arith.constant 9.99999997E-7 : f32
    %316 = vector.broadcast %cst_128 : f32 to vector<2x2x128xf32>
    %317 = arith.addf %315, %316 : vector<2x2x128xf32>
    %318 = math.sqrt %317 : vector<2x2x128xf32>
    %319 = vector.extract_strided_slice %4 {offsets = [0, 19, 0, 0], sizes = [2, 1, 2, 128], strides = [1, 1, 1, 1]} : vector<2x20x2x128xf32> to vector<2x1x2x128xf32>
    %320 = vector.shape_cast %319 : vector<2x1x2x128xf32> to vector<2x2x128xf32>
    %cst_129 = arith.constant 9.99999997E-7 : f32
    %321 = vector.broadcast %cst_129 : f32 to vector<2x2x128xf32>
    %322 = arith.addf %320, %321 : vector<2x2x128xf32>
    %323 = math.sqrt %322 : vector<2x2x128xf32>
    %324 = arith.subf %318, %323 : vector<2x2x128xf32>
    %325 = arith.mulf %313, %313 : vector<2x2x128xf32>
    %326 = arith.mulf %324, %324 : vector<2x2x128xf32>
    %327 = arith.addf %325, %326 : vector<2x2x128xf32>
    %328 = arith.mulf %266, %327 : vector<2x2x128xf32>
    %c0_130 = arith.constant 0 : index
    %c0_131 = arith.constant 0 : index
    %329 = vector.load %arg5[%c0_130, %c0_131] : memref<2x128xf32, #tpu.memory_space<vmem>>, vector<2x128xf32>
    %cst_132 = arith.constant dense<0.000000e+00> : vector<2x128xf32>
    %330 = vector.multi_reduction <add>, %266, %cst_132 [0] : vector<2x2x128xf32> to vector<2x128xf32>
    %331 = arith.addf %329, %330 : vector<2x128xf32>
    %c0_133 = arith.constant 0 : index
    %c0_134 = arith.constant 0 : index
    %332 = vector.load %arg5[%c0_133, %c0_134] : memref<2x128xf32, #tpu.memory_space<vmem>>, vector<2x128xf32>
    tpu.vector_store %arg5[%c0_133, %c0_134], %331 {strides = array<i32>} : memref<2x128xf32, #tpu.memory_space<vmem>>, vector<2x128xf32>,
    %c0_135 = arith.constant 0 : index
    %c0_136 = arith.constant 0 : index
    %333 = vector.load %arg6[%c0_135, %c0_136] : memref<2x128xf32, #tpu.memory_space<vmem>>, vector<2x128xf32>
    %cst_137 = arith.constant dense<0.000000e+00> : vector<2x128xf32>
    %334 = vector.multi_reduction <add>, %286, %cst_137 [0] : vector<2x2x128xf32> to vector<2x128xf32>
    %335 = arith.addf %333, %334 : vector<2x128xf32>
    %c0_138 = arith.constant 0 : index
    %c0_139 = arith.constant 0 : index
    %336 = vector.load %arg6[%c0_138, %c0_139] : memref<2x128xf32, #tpu.memory_space<vmem>>, vector<2x128xf32>
    tpu.vector_store %arg6[%c0_138, %c0_139], %335 {strides = array<i32>} : memref<2x128xf32, #tpu.memory_space<vmem>>, vector<2x128xf32>,
    %c0_140 = arith.constant 0 : index
    %c0_141 = arith.constant 0 : index
    %337 = vector.load %arg7[%c0_140, %c0_141] : memref<2x128xf32, #tpu.memory_space<vmem>>, vector<2x128xf32>
    %cst_142 = arith.constant dense<0.000000e+00> : vector<2x128xf32>
    %338 = vector.multi_reduction <add>, %288, %cst_142 [0] : vector<2x2x128xf32> to vector<2x128xf32>
    %339 = arith.addf %337, %338 : vector<2x128xf32>
    %c0_143 = arith.constant 0 : index
    %c0_144 = arith.constant 0 : index
    %340 = vector.load %arg7[%c0_143, %c0_144] : memref<2x128xf32, #tpu.memory_space<vmem>>, vector<2x128xf32>
    tpu.vector_store %arg7[%c0_143, %c0_144], %339 {strides = array<i32>} : memref<2x128xf32, #tpu.memory_space<vmem>>, vector<2x128xf32>,
    %c0_145 = arith.constant 0 : index
    %c0_146 = arith.constant 0 : index
    %341 = vector.load %arg8[%c0_145, %c0_146] : memref<2x128xf32, #tpu.memory_space<vmem>>, vector<2x128xf32>
    %cst_147 = arith.constant dense<0.000000e+00> : vector<2x128xf32>
    %342 = vector.multi_reduction <add>, %302, %cst_147 [0] : vector<2x2x128xf32> to vector<2x128xf32>
    %343 = arith.addf %341, %342 : vector<2x128xf32>
    %c0_148 = arith.constant 0 : index
    %c0_149 = arith.constant 0 : index
    %344 = vector.load %arg8[%c0_148, %c0_149] : memref<2x128xf32, #tpu.memory_space<vmem>>, vector<2x128xf32>
    tpu.vector_store %arg8[%c0_148, %c0_149], %343 {strides = array<i32>} : memref<2x128xf32, #tpu.memory_space<vmem>>, vector<2x128xf32>,
    %c0_150 = arith.constant 0 : index
    %c0_151 = arith.constant 0 : index
    %345 = vector.load %arg9[%c0_150, %c0_151] : memref<2x128xf32, #tpu.memory_space<vmem>>, vector<2x128xf32>
    %cst_152 = arith.constant dense<0.000000e+00> : vector<2x128xf32>
    %346 = vector.multi_reduction <add>, %328, %cst_152 [0] : vector<2x2x128xf32> to vector<2x128xf32>
    %347 = arith.addf %345, %346 : vector<2x128xf32>
    %c0_153 = arith.constant 0 : index
    %c0_154 = arith.constant 0 : index
    %348 = vector.load %arg9[%c0_153, %c0_154] : memref<2x128xf32, #tpu.memory_space<vmem>>, vector<2x128xf32>
    tpu.vector_store %arg9[%c0_153, %c0_154], %347 {strides = array<i32>} : memref<2x128xf32, #tpu.memory_space<vmem>>, vector<2x128xf32>,
    %c0_i32_155 = arith.constant 0 : i32
    %349 = arith.cmpi eq, %arg1, %c0_i32_155 : i32
    %350 = arith.extui %349 : i1 to i32
    %c0_i32_156 = arith.constant 0 : i32
    %351 = arith.cmpi ne, %350, %c0_i32_156 : i32
    scf.if %351 {
      %c0_157 = arith.constant 0 : index
      %c0_158 = arith.constant 0 : index
      %352 = vector.load %arg5[%c0_157, %c0_158] : memref<2x128xf32, #tpu.memory_space<vmem>>, vector<2x128xf32>
      %cst_159 = arith.constant dense<0.000000e+00> : vector<2xf32>
      %353 = vector.multi_reduction <add>, %352, %cst_159 [1] : vector<2x128xf32> to vector<2xf32>
      %354 = vector.shape_cast %353 : vector<2xf32> to vector<2x1xf32>
      %cst_160 = arith.constant dense<0.000000e+00> : vector<1xf32>
      %355 = vector.multi_reduction <add>, %354, %cst_160 [0] : vector<2x1xf32> to vector<1xf32>
      %356 = vector.shape_cast %355 : vector<1xf32> to vector<1x1xf32>
      %c0_161 = arith.constant 0 : index
      %c0_162 = arith.constant 0 : index
      %357 = vector.load %arg6[%c0_161, %c0_162] : memref<2x128xf32, #tpu.memory_space<vmem>>, vector<2x128xf32>
      %cst_163 = arith.constant dense<0.000000e+00> : vector<2xf32>
      %358 = vector.multi_reduction <add>, %357, %cst_163 [1] : vector<2x128xf32> to vector<2xf32>
      %359 = vector.shape_cast %358 : vector<2xf32> to vector<2x1xf32>
      %cst_164 = arith.constant dense<0.000000e+00> : vector<1xf32>
      %360 = vector.multi_reduction <add>, %359, %cst_164 [0] : vector<2x1xf32> to vector<1xf32>
      %361 = vector.shape_cast %360 : vector<1xf32> to vector<1x1xf32>
      %c0_165 = arith.constant 0 : index
      %c0_166 = arith.constant 0 : index
      %362 = vector.load %arg7[%c0_165, %c0_166] : memref<2x128xf32, #tpu.memory_space<vmem>>, vector<2x128xf32>
      %cst_167 = arith.constant dense<0.000000e+00> : vector<2xf32>
      %363 = vector.multi_reduction <add>, %362, %cst_167 [1] : vector<2x128xf32> to vector<2xf32>
      %364 = vector.shape_cast %363 : vector<2xf32> to vector<2x1xf32>
      %cst_168 = arith.constant dense<0.000000e+00> : vector<1xf32>
      %365 = vector.multi_reduction <add>, %364, %cst_168 [0] : vector<2x1xf32> to vector<1xf32>
      %366 = vector.shape_cast %365 : vector<1xf32> to vector<1x1xf32>
      %c0_169 = arith.constant 0 : index
      %c0_170 = arith.constant 0 : index
      %367 = vector.load %arg8[%c0_169, %c0_170] : memref<2x128xf32, #tpu.memory_space<vmem>>, vector<2x128xf32>
      %cst_171 = arith.constant dense<0.000000e+00> : vector<2xf32>
      %368 = vector.multi_reduction <add>, %367, %cst_171 [1] : vector<2x128xf32> to vector<2xf32>
      %369 = vector.shape_cast %368 : vector<2xf32> to vector<2x1xf32>
      %cst_172 = arith.constant dense<0.000000e+00> : vector<1xf32>
      %370 = vector.multi_reduction <add>, %369, %cst_172 [0] : vector<2x1xf32> to vector<1xf32>
      %371 = vector.shape_cast %370 : vector<1xf32> to vector<1x1xf32>
      %c0_173 = arith.constant 0 : index
      %c0_174 = arith.constant 0 : index
      %372 = vector.load %arg9[%c0_173, %c0_174] : memref<2x128xf32, #tpu.memory_space<vmem>>, vector<2x128xf32>
      %cst_175 = arith.constant dense<0.000000e+00> : vector<2xf32>
      %373 = vector.multi_reduction <add>, %372, %cst_175 [1] : vector<2x128xf32> to vector<2xf32>
      %374 = vector.shape_cast %373 : vector<2xf32> to vector<2x1xf32>
      %cst_176 = arith.constant dense<0.000000e+00> : vector<1xf32>
      %375 = vector.multi_reduction <add>, %374, %cst_176 [0] : vector<2x1xf32> to vector<1xf32>
      %376 = vector.shape_cast %375 : vector<1xf32> to vector<1x1xf32>
      %377 = tpu.iota {dimensions = array<i32: 0>} : vector<8x128xi32>
      %c0_i32_177 = arith.constant 0 : i32
      %378 = vector.broadcast %c0_i32_177 : i32 to vector<8x128xi32>
      %379 = arith.cmpi eq, %377, %378 : vector<8x128xi32>
      %c1_i32 = arith.constant 1 : i32
      %380 = vector.broadcast %c1_i32 : i32 to vector<8x128xi32>
      %381 = arith.cmpi eq, %377, %380 : vector<8x128xi32>
      %c2_i32 = arith.constant 2 : i32
      %382 = vector.broadcast %c2_i32 : i32 to vector<8x128xi32>
      %383 = arith.cmpi eq, %377, %382 : vector<8x128xi32>
      %c3_i32 = arith.constant 3 : i32
      %384 = vector.broadcast %c3_i32 : i32 to vector<8x128xi32>
      %385 = arith.cmpi eq, %377, %384 : vector<8x128xi32>
      %386 = vector.shape_cast %371 : vector<1x1xf32> to vector<1x1xf32>
      %387 = vector.broadcast %386 : vector<1x1xf32> to vector<8x128xf32>
      %388 = vector.shape_cast %376 : vector<1x1xf32> to vector<1x1xf32>
      %389 = vector.broadcast %388 : vector<1x1xf32> to vector<8x128xf32>
      %390 = arith.select %385, %387, %389 : vector<8x128xi1>, vector<8x128xf32>
      %391 = vector.shape_cast %366 : vector<1x1xf32> to vector<1x1xf32>
      %392 = vector.broadcast %391 : vector<1x1xf32> to vector<8x128xf32>
      %393 = arith.select %383, %392, %390 : vector<8x128xi1>, vector<8x128xf32>
      %394 = vector.shape_cast %361 : vector<1x1xf32> to vector<1x1xf32>
      %395 = vector.broadcast %394 : vector<1x1xf32> to vector<8x128xf32>
      %396 = arith.select %381, %395, %393 : vector<8x128xi1>, vector<8x128xf32>
      %397 = vector.shape_cast %356 : vector<1x1xf32> to vector<1x1xf32>
      %398 = vector.broadcast %397 : vector<1x1xf32> to vector<8x128xf32>
      %399 = arith.select %379, %398, %396 : vector<8x128xi1>, vector<8x128xf32>
      %c0_178 = arith.constant 0 : index
      %c0_179 = arith.constant 0 : index
      %c0_180 = arith.constant 0 : index
      %400 = vector.load %arg4[%c0_178, %c0_179, %c0_180] : memref<1x8x128xf32, #tpu.memory_space<vmem>>, vector<1x8x128xf32>
      %401 = vector.shape_cast %400 : vector<1x8x128xf32> to vector<8x128xf32>
      %402 = vector.shape_cast %399 : vector<8x128xf32> to vector<1x8x128xf32>
      tpu.vector_store %arg4[%c0_178, %c0_179, %c0_180], %402 {strides = array<i32>} : memref<1x8x128xf32, #tpu.memory_space<vmem>>, vector<1x8x128xf32>,
    } else {
    }
    return
  }
  func.func @transform_0(%arg0: i32, %arg1: i32) -> (i32, i32, i32, i32) {
    %c0_i32 = arith.constant 0 : i32
    %c0_i32_0 = arith.constant 0 : i32
    %c0_i32_1 = arith.constant 0 : i32
    return %c0_i32, %arg0, %arg1, %c0_i32_0 : i32, i32, i32, i32
  }
  func.func @transform_1(%arg0: i32, %arg1: i32) -> (i32, i32, i32, i32) {
    %c0_i32 = arith.constant 0 : i32
    %c0_i32_0 = arith.constant 0 : i32
    %c0_i32_1 = arith.constant 0 : i32
    return %c0_i32, %arg0, %arg1, %c0_i32_0 : i32, i32, i32, i32
  }
  func.func @transform_2(%arg0: i32, %arg1: i32) -> (i32, i32, i32) {
    %c0_i32 = arith.constant 0 : i32
    %c0_i32_0 = arith.constant 0 : i32
    %c0_i32_1 = arith.constant 0 : i32
    return %arg0, %c0_i32, %c0_i32_0 : i32, i32, i32
  }
}

</mosaic_0001>

<bundles_post_ra>
// kernel: tpu_custom_call.1
= control target key start
LH: loop header
LB: loop body
LE: loop exit
PB: predicated region body
PF: predicated region fallthrough
CT: control target
= control target key end

     0   :  { %7 = vsyncpa [#allocation8], 0  ;;  %s1633_s0 = inlined_call_operand.hbm [shape: f32[2,20,2,128], index: 0, kind: input, shape index: {}]   ;;  %s1634_s1 = inlined_call_operand.hbm [shape: f32[2,20,2,128], index: 1, kind: input, shape index: {}]   ;;  %s1635_s2 = inlined_call_operand.hbm [shape: f32[1,8,128], index: 2, kind: output, shape index: {}]  }
   0x1   :  { %8 = vsyncpa [#allocation11], 0 }
   0x2   :  { %9 = vsyncpa [#allocation9], 0  ;;  %s989_s9 = smov [#allocation7]  }
   0x3   :  { %s15_s10 = sshll.u32 %s989_s9, 4  ;;  %s16_s10 = int_to_ptr.vmem [resolvable:$true] %s15_s10 }
   0x4   :  { %s931_s11 = scalar_lea.vmem %s16_s10, 1280  ;;  %p936_p1 = scmp.lt.s32.totalorder %s16_s10, %s16_s10 }
   0x5   :  { %p932_p0 = scmp.ne.s32.totalorder %s16_s10, %s931_s11  ;;  %p937_p2 = scmp.lt.s32.totalorder %s931_s11, %s931_s11 }
   0x7   :  { %p938_p3 = por %p937_p2, %p936_p1 }
   0x9   :  { %p939_p4 = pnand %p938_p3, %p932_p0 }
   0xb   :  { %942 = shalt.err (!%p939_p4)
}
   0xc   :  { %s990_s12 = smov 32   ;;  %s991_s13 = smov 2  }
   0xd   :  { %21 = dma.hbm_to_vmem [thread:$0]  %s1633_s0, 1280, %s16_s10, [#allocation8], %s990_s12, %s990_s12, %s991_s13  }
   0xe   :  { %s992_s16 = smov [#allocation10]  }
   0xf   :  { %s27_s17 = sshll.u32 %s992_s16, 4  ;;  %s28_s17 = int_to_ptr.vmem [resolvable:$true] %s27_s17 }
  0x10   :  { %s951_s18 = scalar_lea.vmem %s28_s17, 1280  ;;  %p956_p6 = scmp.lt.s32.totalorder %s28_s17, %s28_s17 }
  0x11   :  { %p952_p5 = scmp.ne.s32.totalorder %s28_s17, %s951_s18  ;;  %p957_p7 = scmp.lt.s32.totalorder %s951_s18, %s951_s18 }
  0x13   :  { %p958_p8 = por %p957_p7, %p956_p6 }
  0x15   :  { %p959_p9 = pnand %p958_p8, %p952_p5 }
  0x17   :  { %962 = shalt.err (!%p959_p9)
}
  0x18   :  { %33 = dma.hbm_to_vmem [thread:$0]  %s1634_s1, 1280, %s28_s17, [#allocation11], %s990_s12, %s990_s12, %s991_s13  }
  0x19   :  { %983 = dma.done.wait [#allocation8], 1280  }
  0x1a   :  { %984 = vsyncadd [#allocation8], 4294966016 }
  0x1b   :  { %985 = dma.done.wait [#allocation11], 1280  }
  0x1c   :  { %986 = vsyncadd [#allocation11], 4294966016  ;;  %v993_v0 = vmov 0.0   ;;  %v50_v1 = vld [vmem:[#allocation7 + $0x2] sm:$0x3]  ;;  %vm250_vm0 = vcmask 1041408  }
  0x1d   :  { %47 = vst [vmem:[#allocation5] sm:$0x3] %v993_v0  ;;  %44 = vst [vmem:[#allocation2] sm:$0x3] %v993_v0  ;;  %v51_v2 = vld [vmem:[#allocation7 + $0x4] sm:$0x3] }
  0x1e   :  { %45 = vst [vmem:[#allocation3] sm:$0x3] %v993_v0  ;;  %46 = vst [vmem:[#allocation4] sm:$0x3] %v993_v0  ;;  %v55_v3 = vld [vmem:[#allocation7 + $0xc] sm:$0x3] }
  0x1f   :  { %48 = vst [vmem:[#allocation6] sm:$0x3] %v993_v0  ;;  %v56_v4 = vld [vmem:[#allocation7 + $0xe] sm:$0x3]  ;;  %v90_v5 = vld [vmem:[#allocation10 + $0x2] sm:$0x3] }
  0x20   :  { %v91_v6 = vld [vmem:[#allocation10 + $0x4] sm:$0x3]  ;;  %v95_v7 = vld [vmem:[#allocation10 + $0xc] sm:$0x3]  ;;  %v161_v8 = vsub.f32 %v50_v1, %v90_v5  ;;  %v70_v9 = vld [vmem:[#allocation7 + $0x2a] sm:$0x3] }
  0x21   :  { %v96_v10 = vld [vmem:[#allocation10 + $0xe] sm:$0x3]  ;;  %v163_v11 = vsub.f32 %v51_v2, %v91_v6  ;;  %v312_v12 = vsub.f32 %v55_v3, %v95_v7  ;;  %v60_v13 = vld [vmem:[#allocation7 + $0x16] sm:$0x3]  ;;  %v71_v14 = vld [vmem:[#allocation7 + $0x2c] sm:$0x3] }
  0x22   :  { %v75_v15 = vld [vmem:[#allocation7 + $0x34] sm:$0x3]  ;;  %v76_v16 = vld [vmem:[#allocation7 + $0x36] sm:$0x3]  ;;  %v165_v17 = vmul.f32 %v161_v8, %v161_v8  ;;  %v314_v18 = vsub.f32 %v56_v4, %v96_v10  ;;  %v61_v19 = vld [vmem:[#allocation7 + $0x18] sm:$0x3] }
  0x23   :  { %v80_v20 = vld [vmem:[#allocation7 + $0x3e] sm:$0x3]  ;;  %v1016_v21 = vld [vmem:[#allocation10] sm:$0x3]  ;;  %v110_v22 = vld [vmem:[#allocation10 + $0x2a] sm:$0x3]  ;;  %v167_v23 = vmul.f32 %v163_v11, %v163_v11  ;;  %v316_v28 = vmul.f32 %v312_v12, %v312_v12 }
  0x24   :  { %v100_v24 = vld [vmem:[#allocation10 + $0x16] sm:$0x3]  ;;  %v111_v25 = vld [vmem:[#allocation10 + $0x2c] sm:$0x3]  ;;  %v115_v26 = vld [vmem:[#allocation10 + $0x34] sm:$0x3]  ;;  %v162_v27 = vsub.f32 %v70_v9, %v110_v22  ;;  %v318_v29 = vmul.f32 %v314_v18, %v314_v18 }
  0x25   :  { %v65_v30 = vld [vmem:[#allocation7 + $0x20] sm:$0x3]  ;;  %v66_v31 = vld [vmem:[#allocation7 + $0x22] sm:$0x3]  ;;  %v101_v32 = vld [vmem:[#allocation10 + $0x18] sm:$0x3]  ;;  %v164_v35 = vsub.f32 %v71_v14, %v111_v25  ;;  %v169_v36 = vadd.f32 %v167_v23, %v165_v17  ;;  %v313_v37 = vsub.f32 %v75_v15, %v115_v26  ;;  %v462_v49 = vsub.f32 %v60_v13, %v100_v24 }
  0x26   :  { %v116_v33 = vld [vmem:[#allocation10 + $0x36] sm:$0x3]  ;;  %v120_v34 = vld [vmem:[#allocation10 + $0x3e] sm:$0x3]  ;;  %v81_v38 = vld [vmem:[#allocation7 + $0x40] sm:$0x3]  ;;  %v166_v41 = vmul.f32 %v162_v27, %v162_v27  ;;  %v320_v54 = vadd.f32 %v318_v29, %v316_v28  ;;  %v464_v56 = vsub.f32 %v61_v19, %v101_v32 }
  0x27   :  { %v85_v39 = vld [vmem:[#allocation7 + $0x48] sm:$0x3]  ;;  %v121_v40 = vld [vmem:[#allocation10 + $0x40] sm:$0x3]  ;;  %v315_v42 = vsub.f32 %v76_v16, %v116_v33  ;;  %v86_v43 = vld [vmem:[#allocation7 + $0x4a] sm:$0x3]  ;;  %v168_v46 = vmul.f32 %v164_v35, %v164_v35  ;;  %v171_v47 = vmul.f32 %v169_v36, %v1016_v21  ;;  %v317_v48 = vmul.f32 %v313_v37, %v313_v37 }
  0x28   :  { %v105_v44 = vld [vmem:[#allocation10 + $0x20] sm:$0x3]  ;;  %v106_v45 = vld [vmem:[#allocation10 + $0x22] sm:$0x3]  ;;  %v1019_v50 = vld [vmem:[#allocation10 + $0x28] sm:$0x3]  ;;  %v463_v55 = vsub.f32 %v80_v20, %v120_v34  ;;  %v465_v59 = vsub.f32 %v81_v38, %v121_v40  ;;  %v466_v6 = vmul.f32 %v462_v49, %v462_v49  ;;  %v468_v8 = vmul.f32 %v464_v56, %v464_v56 }
  0x29   :  { %v125_v51 = vld [vmem:[#allocation10 + $0x48] sm:$0x3]  ;;  %v126_v52 = vld [vmem:[#allocation10 + $0x4a] sm:$0x3]  ;;  %v319_v53 = vmul.f32 %v315_v42, %v315_v42  ;;  %v170_v58 = vadd.f32 %v168_v46, %v166_v41  ;;  %v612_v61 = vsub.f32 %v65_v30, %v105_v44  ;;  %v614_v62 = vsub.f32 %v66_v31, %v106_v45  ;;  %v49_v63 = vld [vmem:[#allocation7] sm:$0x3] }
  0x2a   :  { %v1021_v57 = vld [vmem:[#allocation10 + $0xa] sm:$0x3]  ;;  %v1023_v0 = vld [vmem:[#allocation10 + $0x32] sm:$0x3]  ;;  %v269_v2 = vsel %vm250_vm0, %v171_v47, 0.0  ;;  %v613_v3 = vsub.f32 %v85_v39, %v125_v51  ;;  %v615_v4 = vsub.f32 %v86_v43, %v126_v52  ;;  %v467_v7 = vmul.f32 %v463_v55, %v463_v55  ;;  %s994_s0 = smov [#allocation12]  }
  0x2b   :  { %v321_v60 = vadd.f32 %v319_v53, %v317_v48  ;;  %v172_v1 = vmul.f32 %v170_v58, %v1019_v50  ;;  %v322_v5 = vmul.f32 %v320_v54, %v1021_v57  ;;  %v69_v9 = vld [vmem:[#allocation7 + $0x28] sm:$0x3]  ;;  %v268_v10 = vld [vmem:[#allocation5] sm:$0x3]  ;;  %v469_v12 = vmul.f32 %v465_v59, %v465_v59  ;;  %v54_v23 = vld [vmem:[#allocation7 + $0xa] sm:$0x3] }
  0x2c   :  { %821 = vlog2.f32 %v49_v63  ;;  %v135_v13 = vsub.f32 1.0, %v49_v63  ;;  %v616_v16 = vmul.f32 %v612_v61, %v612_v61  ;;  %v618_v17 = vmul.f32 %v614_v62, %v614_v62  ;;  %v74_v24 = vld [vmem:[#allocation7 + $0x32] sm:$0x3]  ;;  %v1030_v25 = vld [vmem:[#allocation10 + $0x14] sm:$0x3]  ;;  %s805_s1 = sshll.u32 %s994_s0, 4  ;;  %s806_s1 = int_to_ptr.vmem [resolvable:$true] %s805_s1 }
  0x2d   :  { %v270_v11 = vsel %vm250_vm0, %v172_v1, 0.0  ;;  %v323_v15 = vmul.f32 %v321_v60, %v1023_v0  ;;  %v617_v18 = vmul.f32 %v613_v3, %v613_v3  ;;  %v619_v19 = vmul.f32 %v615_v4, %v615_v4  ;;  %v1032_v28 = vld [vmem:[#allocation10 + $0x3c] sm:$0x3]  ;;  %v59_v32 = vld [vmem:[#allocation7 + $0x14] sm:$0x3]  ;;  %s963_s21 = scalar_lea.vmem %s806_s1, 128  ;;  %p968_p11 = scmp.lt.s32.totalorder %s806_s1, %s806_s1 }
  0x2e   :  { %v271_v14 = vadd.f32 %v270_v11, %v269_v2  ;;  %823 = vlog2.f32 %v69_v9  ;;  %v136_v20 = vsub.f32 1.0, %v69_v9  ;;  %v470_v26 = vadd.f32 %v468_v8, %v466_v6  ;;  %v79_v34 = vld [vmem:[#allocation7 + $0x3c] sm:$0x3]  ;;  %v1036_v37 = vld [vmem:[#allocation10 + $0x1e] sm:$0x3]  ;;  %p964_p10 = scmp.ne.s32.totalorder %s806_s1, %s963_s21  ;;  %p969_p12 = scmp.lt.s32.totalorder %s963_s21, %s963_s21 }
  0x2f   :  { %v471_v27 = vadd.f32 %v469_v12, %v467_v7  ;;  %825 = vlog2.f32 %v135_v13  ;;  %v419_v29 = vsel %vm250_vm0, %v322_v5, 0.0  ;;  %v420_v30 = vsel %vm250_vm0, %v323_v15, 0.0  ;;  %v1038_v38 = vld [vmem:[#allocation10 + $0x46] sm:$0x3]  ;;  %v64_v46 = vld [vmem:[#allocation7 + $0x1e] sm:$0x3] }
  0x30   :  { %v272_v22 = vadd.f32 %v271_v14, %v268_v10  ;;  %v620_v31 = vadd.f32 %v618_v17, %v616_v16  ;;  %827 = vlog2.f32 %v136_v20  ;;  %v621_v33 = vadd.f32 %v619_v19, %v617_v18  ;;  %v84_v51 = vld [vmem:[#allocation7 + $0x46] sm:$0x3]  ;;  %v72_v1 = vld [vmem:[#allocation7 + $0x2e] sm:$0x3]  ;;  %p970_p13 = por %p969_p12, %p968_p11 }
  0x31   :  { %829 = vlog2.f32 %v54_v23  ;;  %v286_v35 = vsub.f32 1.0, %v54_v23  ;;  %v287_v36 = vsub.f32 1.0, %v74_v24  ;;  %v472_v39 = vmul.f32 %v470_v26, %v1030_v25  ;;  %v52_v54 = vld [vmem:[#allocation7 + $0x6] sm:$0x3] }
  0x32   :  { %273 = vst [vmem:[#allocation5] sm:$0x3] %v272_v22  ;;  %831 = vlog2.f32 %v74_v24  ;;  %v473_v40 = vmul.f32 %v471_v27, %v1032_v28  ;;  %v436_v41 = vsub.f32 1.0, %v59_v32  ;;  %v421_v42 = vadd.f32 %v420_v30, %v419_v29  ;;  %p971_p0 = pnand %p970_p13, %p964_p10 }
  0x33   :  { %833 = vlog2.f32 %v286_v35  ;;  %v437_v43 = vsub.f32 1.0, %v79_v34  ;;  %v622_v44 = vmul.f32 %v620_v31, %v1036_v37  ;;  %v623_v45 = vmul.f32 %v621_v33, %v1038_v38 }
  0x34   :  { %835 = vlog2.f32 %v287_v36  ;;  %v569_v48 = vsel %vm250_vm0, %v472_v39, 0.0  ;;  %v570_v49 = vsel %vm250_vm0, %v473_v40, 0.0  ;;  %v586_v59 = vsub.f32 1.0, %v64_v46 }
  0x35   :  { %837 = vlog2.f32 %v59_v32  ;;  %v719_v55 = vsel %vm250_vm0, %v622_v44, 0.0  ;;  %v720_v56 = vsel %vm250_vm0, %v623_v45, 0.0  ;;  %v571_v61 = vadd.f32 %v570_v49, %v569_v48 }
  0x36   :  { %839 = vlog2.f32 %v79_v34  ;;  %v145_v62 = vsub.f32 1.0, %v1016_v21  ;;  %v587_v63 = vsub.f32 1.0, %v84_v51  ;;  %v146_v4 = vsub.f32 1.0, %v1019_v50 }
  0x37   :  { %841 = vlog2.f32 %v436_v41  ;;  %v1050_v6 = vadd.f32 %v720_v56, %v719_v55  ;;  %vm1643_vm1 = vcmp.lt.f32.partialorder %v1016_v21, 0.5  ;;  %v296_v7 = vsub.f32 1.0, %v1021_v57 }
  0x38   :  { %843 = vlog2.f32 %v437_v43  ;;  %v1054_v8 = vadd.f32 1e-06, %v52_v54  ;;  %vm1642_vm2 = vcmp.lt.f32.partialorder %v1019_v50, 0.5  ;;  %v1057_v12 = vadd.f32 1e-06, %v72_v1 }
  0x39   :  { %v418_v47 = vld [vmem:[#allocation5] sm:$0x3]  ;;  %v822_v52 = vpop.eup %821  ;;  %845 = vlog2.f32 %v64_v46  ;;  %v297_v15 = vsub.f32 1.0, %v1023_v0  ;;  %v446_v16 = vsub.f32 1.0, %v1030_v25  ;;  %v447_v22 = vsub.f32 1.0, %v1032_v28 }
  0x3a   :  { %v422_v53 = vadd.f32 %v421_v42, %v418_v47  ;;  %v130_v58 = vmul.f32 0.6931472, %v822_v52  ;;  %847 = vlog2.f32 %v84_v51  ;;  %vm1641_vm3 = vcmp.lt.f32.partialorder %v1021_v57, 0.5 }
  0x3b   :  { %v824_v60 = vpop.eup %823  ;;  %849 = vlog2.f32 %v586_v59  ;;  %vm1640_vm4 = vcmp.lt.f32.partialorder %v1023_v0, 0.5  ;;  %vm1639_vm5 = vcmp.lt.f32.partialorder %v1030_v25, 0.5  ;;  %vm1638_vm6 = vcmp.lt.f32.partialorder %v1032_v28, 0.5 }
  0x3c   :  { %423 = vst [vmem:[#allocation5] sm:$0x3] %v422_v53  ;;  %v132_v2 = vmul.f32 0.6931472, %v824_v60  ;;  %v133_v3 = vmax.f32 %v130_v58, -100.0  ;;  %v826_v5 = vpop.eup %825  ;;  %851 = vlog2.f32 %v587_v63  ;;  %vm1637_vm7 = vcmp.lt.f32.partialorder %v1036_v37, 0.5 }
  0x3d   :  { %v828_v9 = vpop.eup %827  ;;  %v138_v11 = vmul.f32 0.6931472, %v826_v5  ;;  %853 = vrsqrt.f32 %v1054_v8  ;;  %vm1636_vm8 = vcmp.lt.f32.partialorder %v1038_v38, 0.5  ;;  %vm177_vm9 = vcmp.eq.f32.partialorder %v1054_v8, inf }
  0x3e   :  { %v134_v10 = vmax.f32 %v132_v2, -100.0  ;;  %v830_v13 = vpop.eup %829  ;;  %v140_v14 = vmul.f32 0.6931472, %v828_v9  ;;  %v143_v19 = vmul.f32 %v133_v3, %v1016_v21  ;;  %855 = vrsqrt.f32 %v1057_v12 }
  0x3f   :  { %v832_v17 = vpop.eup %831  ;;  %v141_v18 = vmax.f32 %v138_v11, -100.0  ;;  %v281_v20 = vmul.f32 0.6931472, %v830_v13  ;;  %v262_v11 = vld [vmem:[#allocation4] sm:$0x3]  ;;  %vm179_vm10 = vcmp.eq.f32.partialorder %v1054_v8, 0.0 }
  0x40   :  { %v834_v23 = vpop.eup %833  ;;  %v142_v24 = vmax.f32 %v140_v14, -100.0  ;;  %v144_v26 = vmul.f32 %v134_v10, %v1019_v50  ;;  %v283_v27 = vmul.f32 0.6931472, %v832_v17  ;;  %vm184_vm11 = vcmp.eq.f32.partialorder %v1057_v12, inf }
  0x41   :  { %v836_v29 = vpop.eup %835  ;;  %v147_v31 = vmul.f32 %v145_v62, %v141_v18  ;;  %v284_v32 = vmax.f32 %v281_v20, -100.0  ;;  %v289_v33 = vmul.f32 0.6931472, %v834_v23  ;;  %vm186_vm12 = vcmp.eq.f32.partialorder %v1057_v12, 0.0 }
  0x42   :  { %v838_v34 = vpop.eup %837  ;;  %v148_v36 = vmul.f32 %v146_v4, %v142_v24  ;;  %v285_v39 = vmax.f32 %v283_v27, -100.0  ;;  %v291_v40 = vmul.f32 0.6931472, %v836_v29 }
  0x43   :  { %v568_v30 = vld [vmem:[#allocation5] sm:$0x3]  ;;  %v840_v41 = vpop.eup %839  ;;  %v1068_v42 = vadd.f32 %v147_v31, %v143_v19  ;;  %v292_v43 = vmax.f32 %v289_v33, -100.0  ;;  %v294_v44 = vmul.f32 %v284_v32, %v1021_v57  ;;  %v431_v45 = vmul.f32 0.6931472, %v838_v34 }
  0x44   :  { %v572_v35 = vadd.f32 %v571_v61, %v568_v30  ;;  %v842_v46 = vpop.eup %841  ;;  %v1071_v47 = vadd.f32 %v148_v36, %v144_v26  ;;  %v293_v48 = vmax.f32 %v291_v40, -100.0  ;;  %v295_v49 = vmul.f32 %v285_v39, %v1023_v0  ;;  %v92_v26 = vld [vmem:[#allocation10 + $0x6] sm:$0x3]  ;;  %v112_v40 = vld [vmem:[#allocation10 + $0x2e] sm:$0x3] }
  0x45   :  { %v433_v51 = vmul.f32 0.6931472, %v840_v41  ;;  %v844_v52 = vpop.eup %843  ;;  %v151_v53 = vsub.f32 0.0, %v1068_v42  ;;  %v298_v54 = vmul.f32 %v296_v7, %v292_v43  ;;  %v434_v55 = vmax.f32 %v431_v45, -100.0 }
  0x46   :  { %573 = vst [vmem:[#allocation5] sm:$0x3] %v572_v35  ;;  %v439_v56 = vmul.f32 0.6931472, %v842_v46  ;;  %v152_v58 = vsub.f32 0.0, %v1071_v47  ;;  %v299_v59 = vmul.f32 %v297_v15, %v293_v48  ;;  %v846_v62 = vpop.eup %845  ;;  %v596_v39 = vsub.f32 1.0, %v1036_v37 }
  0x47   :  { %v435_v60 = vmax.f32 %v433_v51, -100.0  ;;  %v441_v61 = vmul.f32 0.6931472, %v844_v52  ;;  %v159_v63 = vsel %vm1643_vm1, %v151_v53, 0.0  ;;  %v1080_v1 = vadd.f32 %v298_v54, %v294_v44  ;;  %v848_v4 = vpop.eup %847  ;;  %v107_v47 = vld [vmem:[#allocation10 + $0x24] sm:$0x3] }
  0x48   :  { %v442_v2 = vmax.f32 %v439_v56, -100.0  ;;  %v444_v3 = vmul.f32 %v434_v55, %v1030_v25  ;;  %v160_v5 = vsel %vm1642_vm2, %v152_v58, 0.0  ;;  %v263_v7 = vsel %vm250_vm0, %v159_v63, 0.0  ;;  %v850_v18 = vpop.eup %849 }
  0x49   :  { %v1088_v9 = vadd.f32 %v299_v59, %v295_v49  ;;  %v443_v10 = vmax.f32 %v441_v61, -100.0  ;;  %v264_v13 = vsel %vm250_vm0, %v160_v5, 0.0  ;;  %v302_v14 = vsub.f32 0.0, %v1080_v1  ;;  %v852_v27 = vpop.eup %851 }
  0x4a   :  { %v445_v15 = vmul.f32 %v435_v60, %v1032_v28  ;;  %v448_v17 = vmul.f32 %v446_v16, %v442_v2  ;;  %v265_v19 = vadd.f32 %v264_v13, %v263_v7  ;;  %v581_v24 = vmul.f32 0.6931472, %v846_v62  ;;  %v854_v34 = vpop.eup %853  ;;  %v53_v2 = vld [vmem:[#allocation7 + $0x8] sm:$0x3]  ;;  %v113_v13 = vld [vmem:[#allocation10 + $0x30] sm:$0x3] }
  0x4b   :  { %v303_v20 = vsub.f32 0.0, %v1088_v9  ;;  %v449_v23 = vmul.f32 %v447_v22, %v443_v10  ;;  %v583_v31 = vmul.f32 0.6931472, %v848_v4  ;;  %v310_v16 = vsel %vm1641_vm3, %v302_v14, 0.0 }
  0x4c   :  { %v1094_v30 = vadd.f32 %v448_v17, %v444_v3  ;;  %v266_v33 = vadd.f32 %v265_v19, %v262_v11  ;;  %v584_v36 = vmax.f32 %v581_v24, -100.0  ;;  %v1108_v41 = vadd.f32 1e-06, %v92_v26  ;;  %v73_v3 = vld [vmem:[#allocation7 + $0x30] sm:$0x3] }
  0x4d   :  { %v718_v29 = vld [vmem:[#allocation5] sm:$0x3]  ;;  %v311_v22 = vsel %vm1640_vm4, %v303_v20, 0.0  ;;  %v1105_v35 = vadd.f32 %v449_v23, %v445_v15  ;;  %v585_v43 = vmax.f32 %v583_v31, -100.0  ;;  %v589_v44 = vmul.f32 0.6931472, %v850_v18 }
  0x4e   :  { %v722_v32 = vadd.f32 %v1050_v6, %v718_v29  ;;  %v856_v6 = vpop.eup %855  ;;  %267 = vst [vmem:[#allocation4] sm:$0x3] %v266_v33  ;;  %v591_v45 = vmul.f32 0.6931472, %v852_v27  ;;  %v597_v46 = vsub.f32 1.0, %v1038_v38  ;;  %v413_v48 = vsel %vm250_vm0, %v310_v16, 0.0 }
  0x4f   :  { %v414_v49 = vsel %vm250_vm0, %v311_v22, 0.0  ;;  %v452_v51 = vsub.f32 0.0, %v1094_v30  ;;  %v592_v52 = vmax.f32 %v589_v44, -100.0  ;;  %v594_v55 = vmul.f32 %v584_v36, %v1036_v37  ;;  %v93_v11 = vld [vmem:[#allocation10 + $0x8] sm:$0x3] }
  0x50   :  { %723 = vst [vmem:[#allocation5] sm:$0x3] %v722_v32  ;;  %v593_v54 = vmax.f32 %v591_v45, -100.0  ;;  %v595_v56 = vmul.f32 %v585_v43, %v1038_v38  ;;  %v453_v59 = vsub.f32 0.0, %v1105_v35  ;;  %v1119_v60 = vadd.f32 1e-06, %v112_v40 }
  0x51   :  { %857 = vrsqrt.f32 %v1108_v41  ;;  %v415_v61 = vadd.f32 %v414_v49, %v413_v48  ;;  %v598_v62 = vmul.f32 %v596_v39, %v592_v52  ;;  %v180_v4 = vand.u32 2147483648, %v1054_v8  ;;  %v57_v44 = vld [vmem:[#allocation7 + $0x10] sm:$0x3]  ;;  %v97_v48 = vld [vmem:[#allocation10 + $0x10] sm:$0x3] }
  0x52   :  { %v599_v63 = vmul.f32 %v597_v46, %v593_v54  ;;  %v460_v5 = vsel %vm1639_vm5, %v452_v51, 0.0  ;;  %v176_v15 = vmul.f32 %v854_v34, %v1054_v8  ;;  %v461_v19 = vsel %vm1638_vm6, %v453_v59, 0.0  ;;  %v77_v46 = vld [vmem:[#allocation7 + $0x38] sm:$0x3]  ;;  %v117_v49 = vld [vmem:[#allocation10 + $0x38] sm:$0x3] }
  0x53   :  { %v1131_v7 = vadd.f32 %v598_v62, %v594_v55  ;;  %v183_v23 = vmul.f32 %v856_v6, %v1057_v12  ;;  %859 = vrsqrt.f32 %v1119_v60  ;;  %v563_v31 = vsel %vm250_vm0, %v460_v5, 0.0 }
  0x54   :  { %v1133_v10 = vadd.f32 %v599_v63, %v595_v56  ;;  %v187_v32 = vand.u32 2147483648, %v1057_v12  ;;  %v1148_v33 = vadd.f32 1e-06, %v53_v2  ;;  %v1150_v16 = vadd.f32 1e-06, %v73_v3 }
  0x55   :  { %v412_v18 = vld [vmem:[#allocation4] sm:$0x3]  ;;  %v602_v27 = vsub.f32 0.0, %v1131_v7  ;;  %v564_v22 = vsel %vm250_vm0, %v461_v19, 0.0  ;;  %v178_v34 = vsel %vm177_vm9, %v1054_v8, %v176_v15  ;;  %v1156_v36 = vadd.f32 1e-06, %v93_v11 }
  0x56   :  { %v416_v26 = vadd.f32 %v415_v61, %v412_v18  ;;  %v603_v29 = vsub.f32 0.0, %v1133_v10  ;;  %v1158_v39 = vadd.f32 1e-06, %v113_v13  ;;  %v185_v40 = vsel %vm184_vm11, %v1057_v12, %v183_v23  ;;  %v58_v15 = vld [vmem:[#allocation7 + $0x12] sm:$0x3] }
  0x57   :  { %v766_v17 = vld [vmem:[#allocation5] sm:$0x3]  ;;  %861 = vrsqrt.f32 %v1148_v33  ;;  %v610_v6 = vsel %vm1637_vm7, %v602_v27, 0.0  ;;  %v565_v45 = vadd.f32 %v564_v22, %v563_v31  ;;  %v181_v12 = vsel %vm179_vm10, %v180_v4, %v178_v34 }
  0x58   :  { %v767_v24 = vsel %vm250_vm0, %v766_v17, 0.0  ;;  %417 = vst [vmem:[#allocation4] sm:$0x3] %v416_v26  ;;  %v611_v43 = vsel %vm1636_vm8, %v603_v29, 0.0  ;;  %863 = vrsqrt.f32 %v1150_v16  ;;  %vm193_vm13 = vcmp.eq.f32.partialorder %v1108_v41, inf }
  0x59   :  { %768 = vadd.xlane.f32.xlu0 %v767_v24  ;;  %865 = vrsqrt.f32 %v1156_v36  ;;  %v1178_v52 = vsel %vm186_vm12, %v187_v32, %v185_v40  ;;  %vm195_vm14 = vcmp.eq.f32.partialorder %v1108_v41, 0.0  ;;  %v196_v54 = vand.u32 2147483648, %v1108_v41  ;;  %v78_v17 = vld [vmem:[#allocation7 + $0x3a] sm:$0x3]  ;;  %v98_v24 = vld [vmem:[#allocation10 + $0x12] sm:$0x3] }
  0x5a   :  { %867 = vrsqrt.f32 %v1158_v39  ;;  %v713_v55 = vsel %vm250_vm0, %v610_v6, 0.0  ;;  %v714_v56 = vsel %vm250_vm0, %v611_v43, 0.0  ;;  %vm200_vm15 = vcmp.eq.f32.partialorder %v1119_v60, inf  ;;  %v118_v6 = vld [vmem:[#allocation10 + $0x3a] sm:$0x3] }
  0x5b   :  { %v1186_v8 = vadd.f32 1e-06, %v57_v44  ;;  %vm202_vm9 = vcmp.eq.f32.partialorder %v1119_v60, 0.0  ;;  %v203_v62 = vand.u32 2147483648, %v1119_v60  ;;  %v1190_v63 = vadd.f32 1e-06, %v77_v46 }
  0x5c   :  { %v1192_v2 = vadd.f32 1e-06, %v97_v48  ;;  %vm211_vm10 = vcmp.eq.f32.partialorder %v1148_v33, inf  ;;  %v1197_v5 = vadd.f32 1e-06, %v117_v49  ;;  %v715_v13 = vadd.f32 %v714_v56, %v713_v55 }
  0x5d   :  { %869 = vrsqrt.f32 %v1186_v8  ;;  %vm213_vm11 = vcmp.eq.f32.partialorder %v1148_v33, 0.0  ;;  %v214_v19 = vand.u32 2147483648, %v1148_v33  ;;  %vm218_vm12 = vcmp.eq.f32.partialorder %v1150_v16, inf }
  0x5e   :  { %v858_v61 = vpop.eup %857  ;;  %871 = vrsqrt.f32 %v1190_v63  ;;  %vm220_vm8 = vcmp.eq.f32.partialorder %v1150_v16, 0.0  ;;  %v221_v26 = vand.u32 2147483648, %v1150_v16  ;;  %vm227_vm7 = vcmp.eq.f32.partialorder %v1156_v36, inf }
  0x5f   :  { %v562_v3 = vld [vmem:[#allocation4] sm:$0x3]  ;;  %v192_v4 = vmul.f32 %v858_v61, %v1108_v41  ;;  %873 = vrsqrt.f32 %v1192_v2  ;;  %vm229_vm6 = vcmp.eq.f32.partialorder %v1156_v36, 0.0  ;;  %v230_v32 = vand.u32 2147483648, %v1156_v36 }
  0x60   :  { %v566_v11 = vadd.f32 %v565_v45, %v562_v3  ;;  %v860_v23 = vpop.eup %859  ;;  %875 = vrsqrt.f32 %v1197_v5  ;;  %vm236_vm5 = vcmp.eq.f32.partialorder %v1158_v39, 0.0  ;;  %v1218_v34 = vadd.f32 1e-06, %v58_v15 }
  0x61   :  { %v194_v18 = vsel %vm193_vm13, %v1108_v41, %v192_v4  ;;  %v199_v31 = vmul.f32 %v860_v23, %v1119_v60  ;;  %vm234_vm13 = vcmp.eq.f32.partialorder %v1158_v39, inf  ;;  %v1220_v40 = vadd.f32 1e-06, %v78_v17 }
  0x62   :  { %567 = vst [vmem:[#allocation4] sm:$0x3] %v566_v11  ;;  %v197_v22 = vsel %vm195_vm14, %v196_v54, %v194_v18  ;;  %v237_v44 = vand.u32 2147483648, %v1158_v39  ;;  %vm328_vm4 = vcmp.eq.f32.partialorder %v1186_v8, inf  ;;  %v1227_v45 = vadd.f32 1e-06, %v98_v24 }
  0x63   :  { %v201_v43 = vsel %vm200_vm15, %v1119_v60, %v199_v31  ;;  %v331_v48 = vand.u32 2147483648, %v1186_v8  ;;  %v338_v49 = vand.u32 2147483648, %v1190_v63  ;;  %877 = vrsqrt.f32 %v1218_v34 }
  0x64   :  { %v862_v46 = vpop.eup %861  ;;  %v204_v41 = vsel %vm202_vm9, %v203_v62, %v201_v43  ;;  %v205_v55 = vsub.f32 %v181_v12, %v197_v22  ;;  %vm330_vm14 = vcmp.eq.f32.partialorder %v1186_v8, 0.0  ;;  %vm335_vm15 = vcmp.eq.f32.partialorder %v1190_v63, inf  ;;  %v62_v43 = vld [vmem:[#allocation7 + $0x1a] sm:$0x3] }
  0x65   :  { %v864_v54 = vpop.eup %863  ;;  %v210_v56 = vmul.f32 %v862_v46, %v1148_v33  ;;  %vm344_vm3 = vcmp.eq.f32.partialorder %v1192_v2, inf  ;;  %879 = vrsqrt.f32 %v1220_v40  ;;  %vm346_vm9 = vcmp.eq.f32.partialorder %v1192_v2, 0.0 }
  0x66   :  { %v866_v60 = vpop.eup %865  ;;  %v217_v61 = vmul.f32 %v864_v54, %v1150_v16  ;;  %v347_v62 = vand.u32 2147483648, %v1192_v2  ;;  %vm351_vm2 = vcmp.eq.f32.partialorder %v1197_v5, inf  ;;  %v1243_v12 = vadd.f32 1e-06, %v118_v6 }
  0x67   :  { %v868_v3 = vpop.eup %867  ;;  %v206_v11 = vsub.f32 %v1178_v52, %v204_v41  ;;  %v212_v15 = vsel %vm211_vm10, %v1148_v33, %v210_v56  ;;  %v226_v17 = vmul.f32 %v866_v60, %v1156_v36  ;;  %881 = vrsqrt.f32 %v1227_v45 }
  0x68   :  { %v215_v23 = vsel %vm213_vm11, %v214_v19, %v212_v15  ;;  %v219_v24 = vsel %vm218_vm12, %v1150_v16, %v217_v61  ;;  %v233_v31 = vmul.f32 %v868_v3, %v1158_v39  ;;  %v241_v6 = vmul.f32 %v205_v55, %v205_v55 }
  0x69   :  { %v712_v4 = vld [vmem:[#allocation4] sm:$0x3]  ;;  %v222_v52 = vsel %vm220_vm8, %v221_v26, %v219_v24  ;;  %v228_v22 = vsel %vm227_vm7, %v1156_v36, %v226_v17  ;;  %vm337_vm10 = vcmp.eq.f32.partialorder %v1190_v63, 0.0  ;;  %vm353_vm1 = vcmp.eq.f32.partialorder %v1197_v5, 0.0 }
  0x6a   :  { %v716_v18 = vadd.f32 %v715_v13, %v712_v4  ;;  %v354_v33 = vand.u32 2147483648, %v1197_v5  ;;  %v870_v13 = vpop.eup %869  ;;  %v231_v19 = vsel %vm229_vm6, %v230_v32, %v228_v22  ;;  %v235_v16 = vsel %vm234_vm13, %v1158_v39, %v233_v31  ;;  %v82_v4 = vld [vmem:[#allocation7 + $0x42] sm:$0x3] }
  0x6b   :  { %vm362_vm8 = vcmp.eq.f32.partialorder %v1218_v34, inf  ;;  %883 = vrsqrt.f32 %v1243_v12  ;;  %v872_v26 = vpop.eup %871  ;;  %v238_v46 = vsel %vm236_vm5, %v237_v44, %v235_v16  ;;  %v239_v41 = vsub.f32 %v215_v23, %v231_v19 }
  0x6c   :  { %717 = vst [vmem:[#allocation4] sm:$0x3] %v716_v18  ;;  %v327_v54 = vmul.f32 %v870_v13, %v1186_v8  ;;  %vm364_vm7 = vcmp.eq.f32.partialorder %v1218_v34, 0.0  ;;  %v874_v36 = vpop.eup %873  ;;  %v240_v32 = vsub.f32 %v222_v52, %v238_v46  ;;  %v242_v55 = vmul.f32 %v206_v11, %v206_v11 }
  0x6d   :  { %v334_v56 = vmul.f32 %v872_v26, %v1190_v63  ;;  %v365_v60 = vand.u32 2147483648, %v1218_v34  ;;  %v243_v61 = vmul.f32 %v239_v41, %v239_v41  ;;  %v343_v39 = vmul.f32 %v874_v36, %v1192_v2  ;;  %v876_v44 = vpop.eup %875 }
  0x6e   :  { %v329_v3 = vsel %vm328_vm4, %v1186_v8, %v327_v54  ;;  %vm369_vm5 = vcmp.eq.f32.partialorder %v1220_v40, inf  ;;  %v244_v15 = vmul.f32 %v240_v32, %v240_v32  ;;  %vm371_vm6 = vcmp.eq.f32.partialorder %v1220_v40, 0.0  ;;  %v102_v32 = vld [vmem:[#allocation10 + $0x1a] sm:$0x3] }
  0x6f   :  { %v372_v11 = vand.u32 2147483648, %v1220_v40  ;;  %v1285_v17 = vadd.f32 1e-06, %v62_v43  ;;  %v245_v18 = vadd.f32 %v243_v61, %v241_v6  ;;  %v345_v23 = vsel %vm344_vm3, %v1192_v2, %v343_v39 }
  0x70   :  { %v350_v24 = vmul.f32 %v876_v44, %v1197_v5  ;;  %vm378_vm4 = vcmp.eq.f32.partialorder %v1227_v45, inf  ;;  %v246_v31 = vadd.f32 %v244_v15, %v242_v55  ;;  %v332_v52 = vsel %vm330_vm14, %v331_v48, %v329_v3  ;;  %v878_v6 = vpop.eup %877  ;;  %v274_v55 = vld [vmem:[#allocation6] sm:$0x3]  ;;  %v63_v44 = vld [vmem:[#allocation7 + $0x1c] sm:$0x3] }
  0x71   :  { %v336_v22 = vsel %vm335_vm15, %v1190_v63, %v334_v56  ;;  %vm380_vm11 = vcmp.eq.f32.partialorder %v1227_v45, 0.0  ;;  %v247_v19 = vmul.f32 %v245_v18, %v1016_v21  ;;  %v348_v16 = vsel %vm346_vm9, %v347_v62, %v345_v23 }
  0x72   :  { %v352_v26 = vsel %vm351_vm2, %v1197_v5, %v350_v24  ;;  %v1306_v43 = vadd.f32 1e-06, %v82_v4  ;;  %v880_v8 = vpop.eup %879  ;;  %v248_v46 = vmul.f32 %v246_v31, %v1019_v50  ;;  %v361_v41 = vmul.f32 %v878_v6, %v1218_v34  ;;  %v122_v4 = vld [vmem:[#allocation10 + $0x42] sm:$0x3] }
  0x73   :  { %v755_v13 = vld [vmem:[#allocation4] sm:$0x3]  ;;  %885 = vrsqrt.f32 %v1285_v17  ;;  %v275_v54 = vsel %vm250_vm0, %v247_v19, 0.0  ;;  %v368_v2 = vmul.f32 %v880_v8, %v1220_v40  ;;  %v381_v62 = vand.u32 2147483648, %v1227_v45  ;;  %v83_v19 = vld [vmem:[#allocation7 + $0x44] sm:$0x3] }
  0x74   :  { %v756_v48 = vsel %vm250_vm0, %v755_v13, 0.0  ;;  %vm385_vm2 = vcmp.eq.f32.partialorder %v1243_v12, inf  ;;  %v882_v36 = vpop.eup %881  ;;  %v276_v56 = vsel %vm250_vm0, %v248_v46, 0.0  ;;  %v339_v61 = vsel %vm337_vm10, %v338_v49, %v336_v22 }
  0x75   :  { %757 = vadd.xlane.f32.xlu1 %v756_v48  ;;  %v355_v3 = vsel %vm353_vm1, %v354_v33, %v352_v26  ;;  %v363_v39 = vsel %vm362_vm8, %v1218_v34, %v361_v41  ;;  %v277_v15 = vadd.f32 %v276_v56, %v275_v54  ;;  %v356_v18 = vsub.f32 %v332_v52, %v348_v16  ;;  %v103_v48 = vld [vmem:[#allocation10 + $0x1c] sm:$0x3]  ;;  %v123_v54 = vld [vmem:[#allocation10 + $0x44] sm:$0x3] }
  0x76   :  { %v377_v23 = vmul.f32 %v882_v36, %v1227_v45  ;;  %vm387_vm3 = vcmp.eq.f32.partialorder %v1243_v12, 0.0  ;;  %v366_v24 = vsel %vm364_vm7, %v365_v60, %v363_v39  ;;  %v370_v63 = vsel %vm369_vm5, %v1220_v40, %v368_v2 }
  0x77   :  { %v388_v5 = vand.u32 2147483648, %v1243_v12  ;;  %887 = vrsqrt.f32 %v1306_v43  ;;  %v278_v33 = vadd.f32 %v277_v15, %v274_v55  ;;  %v357_v31 = vsub.f32 %v339_v61, %v355_v3  ;;  %v87_v15 = vld [vmem:[#allocation7 + $0x4c] sm:$0x3] }
  0x78   :  { %v884_v49 = vpop.eup %883  ;;  %v379_v52 = vsel %vm378_vm4, %v1227_v45, %v377_v23  ;;  %v1338_v22 = vadd.f32 1e-06, %v102_v32  ;;  %v1343_v6 = vadd.f32 1e-06, %v122_v4  ;;  %v1345_v13 = vadd.f32 1e-06, %v63_v44 }
  0x79   :  { %v382_v34 = vsel %vm380_vm11, %v381_v62, %v379_v52  ;;  %v384_v60 = vmul.f32 %v884_v49, %v1243_v12  ;;  %279 = vst [vmem:[#allocation6] sm:$0x3] %v278_v33  ;;  %v373_v16 = vsel %vm371_vm6, %v372_v11, %v370_v63  ;;  %v392_v8 = vmul.f32 %v356_v18, %v356_v18  ;;  %v67_v4 = vld [vmem:[#allocation7 + $0x24] sm:$0x3]  ;;  %v127_v23 = vld [vmem:[#allocation10 + $0x4c] sm:$0x3] }
  0x7a   :  { %v390_v26 = vsub.f32 %v366_v24, %v382_v34  ;;  %889 = vrsqrt.f32 %v1338_v22  ;;  %v393_v62 = vmul.f32 %v357_v31, %v357_v31  ;;  %v1356_v40 = vadd.f32 1e-06, %v83_v19 }
  0x7b   :  { %v386_v45 = vsel %vm385_vm2, %v1243_v12, %v384_v60  ;;  %891 = vrsqrt.f32 %v1343_v6  ;;  %v1359_v36 = vadd.f32 1e-06, %v103_v48  ;;  %v1363_v32 = vsel %vm250_vm0, %v1016_v21, 0.0 }
  0x7c   :  { %v389_v46 = vsel %vm387_vm3, %v388_v5, %v386_v45  ;;  %v394_v41 = vmul.f32 %v390_v26, %v390_v26  ;;  %893 = vrsqrt.f32 %v1345_v13  ;;  %v1367_v55 = vsel %vm250_vm0, %v1019_v50, 0.0 }
  0x7d   :  { %v391_v2 = vsub.f32 %v373_v16, %v389_v46  ;;  %895 = vrsqrt.f32 %v1356_v40  ;;  %v1373_v56 = vmul.f32 %v151_v53, %v1016_v21  ;;  %v1378_v61 = vmul.f32 %v152_v58, %v1019_v50 }
  0x7e   :  { %v396_v11 = vadd.f32 %v394_v41, %v392_v8  ;;  %vm478_vm1 = vcmp.eq.f32.partialorder %v1285_v17, inf  ;;  %vm480_vm12 = vcmp.eq.f32.partialorder %v1285_v17, 0.0  ;;  %v1383_v44 = vadd.f32 1e-06, %v123_v54 }
  0x7f   :  { %v395_v12 = vmul.f32 %v391_v2, %v391_v2  ;;  %v481_v42 = vand.u32 2147483648, %v1285_v17  ;;  %vm485_vm13 = vcmp.eq.f32.partialorder %v1306_v43, inf  ;;  %897 = vrsqrt.f32 %v1359_v36  ;;  %v68_v2 = vld [vmem:[#allocation7 + $0x26] sm:$0x3] }
  0x80   :  { %v886_v3 = vpop.eup %885  ;;  %v398_v39 = vmul.f32 %v396_v11, %v1021_v57  ;;  %v488_v53 = vand.u32 2147483648, %v1306_v43  ;;  %vm494_vm14 = vcmp.eq.f32.partialorder %v1338_v22, inf  ;;  %vm496_vm15 = vcmp.eq.f32.partialorder %v1338_v22, 0.0  ;;  %v424_v52 = vld [vmem:[#allocation6] sm:$0x3] }
  0x81   :  { %v397_v18 = vadd.f32 %v395_v12, %v393_v62  ;;  %v497_v58 = vand.u32 2147483648, %v1338_v22  ;;  %v477_v5 = vmul.f32 %v886_v3, %v1285_v17  ;;  %vm487_vm9 = vcmp.eq.f32.partialorder %v1306_v43, 0.0  ;;  %v88_v3 = vld [vmem:[#allocation7 + $0x4e] sm:$0x3] }
  0x82   :  { %v425_v63 = vsel %vm250_vm0, %v398_v39, 0.0  ;;  %899 = vrsqrt.f32 %v1383_v44  ;;  %vm501_vm10 = vcmp.eq.f32.partialorder %v1343_v6, inf  ;;  %vm503_vm8 = vcmp.eq.f32.partialorder %v1343_v6, 0.0 }
  0x83   :  { %v399_v24 = vmul.f32 %v397_v18, %v1023_v0  ;;  %v1399_v33 = vadd.f32 1e-06, %v67_v4  ;;  %v1401_v31 = vadd.f32 1e-06, %v87_v15  ;;  %v504_v60 = vand.u32 2147483648, %v1343_v6 }
  0x84   :  { %v888_v49 = vpop.eup %887  ;;  %v1405_v19 = vadd.f32 1e-06, %v107_v47  ;;  %v1410_v16 = vmul.f32 %v302_v14, %v1021_v57  ;;  %vm512_vm7 = vcmp.eq.f32.partialorder %v1345_v13, inf  ;;  %v1414_v8 = vadd.f32 1e-06, %v127_v23 }
  0x85   :  { %v426_v34 = vsel %vm250_vm0, %v399_v24, 0.0  ;;  %901 = vrsqrt.f32 %v1399_v33  ;;  %v479_v45 = vsel %vm478_vm1, %v1285_v17, %v477_v5  ;;  %v484_v46 = vmul.f32 %v888_v49, %v1306_v43 }
  0x86   :  { %v427_v26 = vadd.f32 %v426_v34, %v425_v63  ;;  %vm514_vm5 = vcmp.eq.f32.partialorder %v1345_v13, 0.0  ;;  %v515_v1 = vand.u32 2147483648, %v1345_v13  ;;  %vm519_vm6 = vcmp.eq.f32.partialorder %v1356_v40, inf }
  0x87   :  { %v890_v48 = vpop.eup %889  ;;  %903 = vrsqrt.f32 %v1401_v31  ;;  %vm521_vm4 = vcmp.eq.f32.partialorder %v1356_v40, 0.0  ;;  %v522_v11 = vand.u32 2147483648, %v1356_v40  ;;  %v482_v39 = vsel %vm480_vm12, %v481_v42, %v479_v45 }
  0x88   :  { %v892_v14 = vpop.eup %891  ;;  %v428_v41 = vadd.f32 %v427_v26, %v424_v52  ;;  %v493_v54 = vmul.f32 %v890_v48, %v1338_v22  ;;  %905 = vrsqrt.f32 %v1405_v19  ;;  %vm528_vm11 = vcmp.eq.f32.partialorder %v1359_v36, inf  ;;  %v108_v26 = vld [vmem:[#allocation10 + $0x26] sm:$0x3]  ;;  %v128_v48 = vld [vmem:[#allocation10 + $0x4e] sm:$0x3] }
  0x89   :  { %v500_v62 = vmul.f32 %v892_v14, %v1343_v6  ;;  %v894_v12 = vpop.eup %893  ;;  %907 = vrsqrt.f32 %v1414_v8  ;;  %v486_v15 = vsel %vm485_vm13, %v1306_v43, %v484_v46  ;;  %vm530_vm2 = vcmp.eq.f32.partialorder %v1359_v36, 0.0 }
  0x8a   :  { %429 = vst [vmem:[#allocation6] sm:$0x3] %v428_v41  ;;  %v495_v4 = vsel %vm494_vm14, %v1338_v22, %v493_v54  ;;  %v511_v47 = vmul.f32 %v894_v12, %v1345_v13  ;;  %v896_v17 = vpop.eup %895  ;;  %v531_v23 = vand.u32 2147483648, %v1359_v36  ;;  %vm535_vm3 = vcmp.eq.f32.partialorder %v1383_v44, inf }
  0x8b   :  { %v502_v18 = vsel %vm501_vm10, %v1343_v6, %v500_v62  ;;  %v498_v42 = vsel %vm496_vm15, %v497_v58, %v495_v4  ;;  %v1448_v24 = vadd.f32 1e-06, %v68_v2  ;;  %v518_v5 = vmul.f32 %v896_v17, %v1356_v40 }
  0x8c   :  { %v513_v63 = vsel %vm512_vm7, %v1345_v13, %v511_v47  ;;  %vm537_vm1 = vcmp.eq.f32.partialorder %v1383_v44, 0.0  ;;  %v1455_v49 = vadd.f32 1e-06, %v88_v3  ;;  %v898_v52 = vpop.eup %897  ;;  %v489_v22 = vsel %vm487_vm9, %v488_v53, %v486_v15 }
  0x8d   :  { %v505_v58 = vsel %vm503_vm8, %v504_v60, %v502_v18  ;;  %v538_v34 = vand.u32 2147483648, %v1383_v44  ;;  %909 = vrsqrt.f32 %v1448_v24  ;;  %v506_v45 = vsub.f32 %v482_v39, %v498_v42 }
  0x8e   :  { %v520_v46 = vsel %vm519_vm6, %v1356_v40, %v518_v5  ;;  %v527_v14 = vmul.f32 %v898_v52, %v1359_v36  ;;  %vm628_vm12 = vcmp.eq.f32.partialorder %v1399_v33, inf  ;;  %v516_v6 = vsel %vm514_vm5, %v515_v1, %v513_v63 }
  0x8f   :  { %v900_v43 = vpop.eup %899  ;;  %vm630_vm13 = vcmp.eq.f32.partialorder %v1399_v33, 0.0  ;;  %v631_v53 = vand.u32 2147483648, %v1399_v33  ;;  %v638_v60 = vand.u32 2147483648, %v1401_v31  ;;  %911 = vrsqrt.f32 %v1455_v49 }
  0x90   :  { %v507_v41 = vsub.f32 %v489_v22, %v505_v58  ;;  %v529_v54 = vsel %vm528_vm11, %v1359_v36, %v527_v14  ;;  %v534_v2 = vmul.f32 %v900_v43, %v1383_v44  ;;  %vm635_vm14 = vcmp.eq.f32.partialorder %v1401_v31, inf }
  0x91   :  { %vm644_vm15 = vcmp.eq.f32.partialorder %v1405_v19, inf  ;;  %v523_v13 = vsel %vm521_vm4, %v522_v11, %v520_v46  ;;  %v532_v1 = vsel %vm530_vm2, %v531_v23, %v529_v54  ;;  %vm646_vm9 = vcmp.eq.f32.partialorder %v1405_v19, 0.0  ;;  %v256_v46 = vld [vmem:[#allocation3] sm:$0x3]  ;;  %v1525_v54 = vld [vmem:[#allocation10 + $0x32] sm:$0x3] }
  0x92   :  { %v1485_v62 = vadd.f32 1e-06, %v108_v26  ;;  %v1487_v12 = vadd.f32 1e-06, %v128_v48  ;;  %v902_v3 = vpop.eup %901  ;;  %v536_v39 = vsel %vm535_vm3, %v1383_v44, %v534_v2  ;;  %v540_v4 = vsub.f32 %v516_v6, %v532_v1  ;;  %v1530_v1 = vld [vmem:[#allocation10 + $0x3c] sm:$0x3] }
  0x93   :  { %v542_v15 = vmul.f32 %v506_v45, %v506_v45  ;;  %v647_v18 = vand.u32 2147483648, %v1405_v19  ;;  %v539_v40 = vsel %vm537_vm1, %v538_v34, %v536_v39  ;;  %v627_v36 = vmul.f32 %v902_v3, %v1399_v33 }
  0x94   :  { %vm637_vm10 = vcmp.eq.f32.partialorder %v1401_v31, 0.0  ;;  %913 = vrsqrt.f32 %v1485_v62  ;;  %vm1644_vm8 = vcmp.lt.f32.partialorder %v1016_v21, 0.5  ;;  %v904_v47 = vpop.eup %903  ;;  %v541_v17 = vsub.f32 %v523_v13, %v539_v40 }
  0x95   :  { %v157_v11 = vsel %vm1644_vm8, 0.0, %v1373_v56  ;;  %v543_v42 = vmul.f32 %v507_v41, %v507_v41  ;;  %v544_v23 = vmul.f32 %v540_v4, %v540_v4  ;;  %vm651_vm7 = vcmp.eq.f32.partialorder %v1414_v8, inf  ;;  %v906_v63 = vpop.eup %905 }
  0x96   :  { %vm653_vm5 = vcmp.eq.f32.partialorder %v1414_v8, 0.0  ;;  %v654_v44 = vand.u32 2147483648, %v1414_v8  ;;  %915 = vrsqrt.f32 %v1487_v12  ;;  %vm1645_vm6 = vcmp.lt.f32.partialorder %v1019_v50, 0.5  ;;  %v908_v52 = vpop.eup %907  ;;  %v1516_v50 = vld [vmem:[#allocation10 + $0x14] sm:$0x3] }
  0x97   :  { %v158_v5 = vsel %vm1645_vm6, 0.0, %v1378_v61  ;;  %v545_v21 = vmul.f32 %v541_v17, %v541_v17  ;;  %v546_v56 = vadd.f32 %v544_v23, %v542_v15  ;;  %vm662_vm4 = vcmp.eq.f32.partialorder %v1448_v24, inf }
  0x98   :  { %v257_v22 = vsel %vm250_vm0, %v157_v11, 0.0  ;;  %v629_v58 = vsel %vm628_vm12, %v1399_v33, %v627_v36  ;;  %v634_v34 = vmul.f32 %v904_v47, %v1401_v31  ;;  %v643_v26 = vmul.f32 %v906_v63, %v1405_v19  ;;  %v574_v11 = vld [vmem:[#allocation6] sm:$0x3] }
  0x99   :  { %v650_v48 = vmul.f32 %v908_v52, %v1414_v8  ;;  %v547_v45 = vadd.f32 %v545_v21, %v543_v42  ;;  %v548_v61 = vmul.f32 %v1516_v50, %v546_v56  ;;  %vm664_vm11 = vcmp.eq.f32.partialorder %v1448_v24, 0.0 }
  0x9a   :  { %v258_v14 = vsel %vm250_vm0, %v158_v5, 0.0  ;;  %v645_v43 = vsel %vm644_vm15, %v1405_v19, %v643_v26  ;;  %v665_v6 = vand.u32 2147483648, %v1448_v24  ;;  %v307_v2 = vmul.f32 %v1525_v54, %v303_v20  ;;  %v910_v13 = vpop.eup %909 }
  0x9b   :  { %v259_v41 = vadd.f32 %v258_v14, %v257_v22  ;;  %v549_v3 = vmul.f32 %v1530_v1, %v547_v45  ;;  %v575_v39 = vsel %vm250_vm0, %v548_v61, 0.0  ;;  %v632_v4 = vsel %vm630_vm13, %v631_v53, %v629_v58  ;;  %v249_v58 = vld [vmem:[#allocation2] sm:$0x3] }
  0x9c   :  { %vm669_vm2 = vcmp.eq.f32.partialorder %v1455_v49, inf  ;;  %v636_v15 = vsel %vm635_vm14, %v1401_v31, %v634_v34  ;;  %v652_v9 = vsel %vm651_vm7, %v1414_v8, %v650_v48  ;;  %v661_v20 = vmul.f32 %v910_v13, %v1448_v24  ;;  %v912_v36 = vpop.eup %911 }
  0x9d   :  { %v260_v40 = vadd.f32 %v259_v41, %v256_v46  ;;  %v576_v47 = vsel %vm250_vm0, %v549_v3, 0.0  ;;  %v648_v33 = vsel %vm646_vm9, %v647_v18, %v645_v43  ;;  %vm1646_vm3 = vcmp.lt.f32.partialorder %v1021_v57, 0.5 }
  0x9e   :  { %v308_v53 = vsel %vm1646_vm3, 0.0, %v1410_v16  ;;  %vm1647_vm1 = vcmp.lt.f32.partialorder %v1023_v0, 0.5  ;;  %v577_v42 = vadd.f32 %v576_v47, %v575_v39  ;;  %v668_v23 = vmul.f32 %v912_v36, %v1455_v49 }
  0x9f   :  { %v309_v17 = vsel %vm1647_vm1, 0.0, %v307_v2  ;;  %vm671_vm12 = vcmp.eq.f32.partialorder %v1455_v49, 0.0  ;;  %v672_v63 = vand.u32 2147483648, %v1455_v49  ;;  %261 = vst [vmem:[#allocation3] sm:$0x3] %v260_v40  ;;  %v639_v19 = vsel %vm637_vm10, %v638_v60, %v636_v15 }
  0xa0   :  { %vm678_vm13 = vcmp.eq.f32.partialorder %v1485_v62, inf  ;;  %v407_v57 = vsel %vm250_vm0, %v308_v53, 0.0  ;;  %v408_v0 = vsel %vm250_vm0, %v309_v17, 0.0  ;;  %v578_v16 = vadd.f32 %v577_v42, %v574_v11 }
  0xa1   :  { %v655_v18 = vsel %vm653_vm5, %v654_v44, %v652_v9  ;;  %v656_v5 = vsub.f32 %v632_v4, %v648_v33  ;;  %v663_v52 = vsel %vm662_vm4, %v1448_v24, %v661_v20  ;;  %v914_v21 = vpop.eup %913  ;;  %v670_v31 = vsel %vm669_vm2, %v1455_v49, %v668_v23  ;;  %v922_v33 = vld [vmem:[#allocation10 + $0x46] sm:$0x3] }
  0xa2   :  { %vm680_vm14 = vcmp.eq.f32.partialorder %v1485_v62, 0.0  ;;  %v681_v60 = vand.u32 2147483648, %v1485_v62  ;;  %v456_v56 = vmul.f32 %v1516_v50, %v452_v51  ;;  %579 = vst [vmem:[#allocation6] sm:$0x3] %v578_v16  ;;  %v677_v8 = vmul.f32 %v914_v21, %v1485_v62 }
  0xa3   :  { %v409_v44 = vadd.f32 %v408_v0, %v407_v57  ;;  %v457_v22 = vmul.f32 %v1530_v1, %v453_v59  ;;  %v253_v34 = vadd.f32 %v1367_v55, %v1363_v32  ;;  %v916_v26 = vpop.eup %915  ;;  %v657_v48 = vsub.f32 %v639_v19, %v655_v18 }
  0xa4   :  { %v666_v45 = vsel %vm664_vm11, %v665_v6, %v663_v52  ;;  %vm685_vm15 = vcmp.eq.f32.partialorder %v1487_v12, inf  ;;  %v688_v30 = vand.u32 2147483648, %v1487_v12  ;;  %v679_v51 = vsel %vm678_vm13, %v1485_v62, %v677_v8  ;;  %v920_v62 = vld [vmem:[#allocation10 + $0xa] sm:$0x3] }
  0xa5   :  { %v684_v35 = vmul.f32 %v916_v26, %v1487_v12  ;;  %vm687_vm9 = vcmp.eq.f32.partialorder %v1487_v12, 0.0  ;;  %v692_v59 = vmul.f32 %v656_v5, %v656_v5  ;;  %v673_v32 = vsel %vm671_vm12, %v672_v63, %v670_v31 }
  0xa6   :  { %v682_v55 = vsel %vm680_vm14, %v681_v60, %v679_v51  ;;  %v406_v24 = vld [vmem:[#allocation3] sm:$0x3]  ;;  %vm1648_vm10 = vcmp.lt.f32.partialorder %v1030_v25, 0.5  ;;  %v254_v46 = vadd.f32 %v253_v34, %v249_v58  ;;  %vm1649_vm8 = vcmp.lt.f32.partialorder %v1032_v28, 0.5  ;;  %v921_v28 = vld [vmem:[#allocation10 + $0x1e] sm:$0x3] }
  0xa7   :  { %v458_v61 = vsel %vm1648_vm10, 0.0, %v456_v56  ;;  %v686_v14 = vsel %vm685_vm15, %v1487_v12, %v684_v35  ;;  %v690_v43 = vsub.f32 %v666_v45, %v682_v55  ;;  %v410_v6 = vadd.f32 %v409_v44, %v406_v24 }
  0xa8   :  { %v459_v41 = vsel %vm1649_vm8, 0.0, %v457_v22  ;;  %v689_v2 = vsel %vm687_vm9, %v688_v30, %v686_v14  ;;  %v693_v13 = vmul.f32 %v657_v48, %v657_v48  ;;  %255 = vst [vmem:[#allocation2] sm:$0x3] %v254_v46  ;;  %v401_v39 = vsel %vm250_vm0, %v920_v62, 0.0 }
  0xa9   :  { %v691_v49 = vsub.f32 %v673_v32, %v689_v2  ;;  %v694_v3 = vmul.f32 %v690_v43, %v690_v43  ;;  %411 = vst [vmem:[#allocation3] sm:$0x3] %v410_v6  ;;  %v402_v25 = vsel %vm250_vm0, %v1525_v54, 0.0  ;;  %v557_v4 = vsel %vm250_vm0, %v458_v61, 0.0  ;;  %v724_v19 = vld [vmem:[#allocation6] sm:$0x3] }
  0xaa   :  { %v558_v12 = vsel %vm250_vm0, %v459_v41, 0.0  ;;  %v606_v20 = vmul.f32 %v921_v28, %v602_v27  ;;  %v403_v40 = vadd.f32 %v402_v25, %v401_v39  ;;  %v607_v53 = vmul.f32 %v922_v33, %v603_v29 }
  0xab   :  { %v695_v15 = vmul.f32 %v691_v49, %v691_v49  ;;  %v696_v9 = vadd.f32 %v694_v3, %v692_v59  ;;  %v559_v47 = vadd.f32 %v558_v12, %v557_v4  ;;  %vm1650_vm7 = vcmp.lt.f32.partialorder %v1036_v37, 0.5 }
  0xac   :  { %v608_v7 = vsel %vm1650_vm7, 0.0, %v606_v20  ;;  %vm1651_vm5 = vcmp.lt.f32.partialorder %v1038_v38, 0.5  ;;  %v551_v10 = vsel %vm250_vm0, %v1516_v50, 0.0  ;;  %v552_v29 = vsel %vm250_vm0, %v1530_v1, 0.0 }
  0xad   :  { %v697_v36 = vadd.f32 %v695_v15, %v693_v13  ;;  %v698_v11 = vmul.f32 %v921_v28, %v696_v9  ;;  %v609_v27 = vsel %vm1651_vm5, 0.0, %v607_v53  ;;  %v707_v5 = vsel %vm250_vm0, %v608_v7, 0.0 }
  0xae   :  { %v708_v52 = vsel %vm250_vm0, %v609_v27, 0.0  ;;  %v553_v37 = vadd.f32 %v552_v29, %v551_v10  ;;  %v701_v50 = vsel %vm250_vm0, %v921_v28, 0.0  ;;  %v702_v44 = vsel %vm250_vm0, %v922_v33, 0.0 }
  0xaf   :  { %v699_v17 = vmul.f32 %v922_v33, %v697_v36  ;;  %v725_v54 = vsel %vm250_vm0, %v698_v11, 0.0  ;;  %v400_v42 = vld [vmem:[#allocation2] sm:$0x3]  ;;  %v709_v21 = vadd.f32 %v708_v52, %v707_v5  ;;  %v703_v22 = vadd.f32 %v702_v44, %v701_v50 }
  0xb0   :  { %v556_v23 = vld [vmem:[#allocation3] sm:$0x3]  ;;  %v404_v63 = vadd.f32 %v403_v40, %v400_v42  ;;  %v788_v4 = vlaneseq }
  0xb1   :  { %v726_v57 = vsel %vm250_vm0, %v699_v17, 0.0  ;;  %v560_v0 = vadd.f32 %v559_v47, %v556_v23 }
  0xb2   :  { %v727_v16 = vadd.f32 %v726_v57, %v725_v54  ;;  %405 = vst [vmem:[#allocation2] sm:$0x3] %v404_v63  ;;  %v789_v40 = vshrl.u32 %v788_v4, 7 }
  0xb3   :  { %561 = vst [vmem:[#allocation3] sm:$0x3] %v560_v0 }
  0xb4   :  { %v728_v18 = vadd.f32 %v727_v16, %v724_v19  ;;  %vm793_vm6 = vcmp.eq.s32.totalorder %v789_v40, 3  ;;  %vm792_vm4 = vcmp.eq.s32.totalorder %v789_v40, 2  ;;  %vm791_vm11 = vcmp.eq.s32.totalorder %v789_v40, 1 }
  0xb5   :  { %vm790_vm2 = vcmp.eq.s32.totalorder %v789_v40, 0 }
  0xb6   :  { %729 = vst [vmem:[#allocation6] sm:$0x3] %v728_v18 }
  0xb9   :  { %v550_v31 = vld [vmem:[#allocation2] sm:$0x3] }
  0xba   :  { %v706_v38 = vld [vmem:[#allocation3] sm:$0x3]  ;;  %v554_v60 = vadd.f32 %v553_v37, %v550_v31 }
  0xbb   :  { %v710_v56 = vadd.f32 %v709_v21, %v706_v38 }
  0xbc   :  { %555 = vst [vmem:[#allocation2] sm:$0x3] %v554_v60 }
  0xbd   :  { %v777_v8 = vld [vmem:[#allocation6] sm:$0x3]  ;;  %711 = vst [vmem:[#allocation3] sm:$0x3] %v710_v56 }
  0xbe   :  { %v778_v1 = vsel %vm250_vm0, %v777_v8, 0.0 }
  0xbf   :  { %779 = vadd.xlane.f32.xlu0 %v778_v1 }
  0xc3   :  { %v700_v58 = vld [vmem:[#allocation2] sm:$0x3] }
  0xc4   :  { %v744_v34 = vld [vmem:[#allocation3] sm:$0x3]  ;;  %v704_v26 = vadd.f32 %v703_v22, %v700_v58 }
  0xc5   :  { %v745_v48 = vsel %vm250_vm0, %v744_v34, 0.0 }
  0xc6   :  { %746 = vadd.xlane.f32.xlu1 %v745_v48  ;;  %705 = vst [vmem:[#allocation2] sm:$0x3] %v704_v26 }
  0xcd   :  { %v733_v45 = vld [vmem:[#allocation2] sm:$0x3] }
  0xce   :  { %v734_v30 = vsel %vm250_vm0, %v733_v45, 0.0 }
  0xcf   :  { %735 = vadd.xlane.f32.xlu0 %v734_v30 }
  0xe2   :  { %v769_v51 = vpop.xlane.xlu0 %768 }
  0xe3   :  { %v770_v35 = vsel %vm250_vm0, %v769_v51, 0.0 }
  0xe4   :  { %v771_v32 = vrot.slane %v770_v35, 4 }
  0xe6   :  { %v772_v43 = vadd.f32 %v771_v32, %v770_v35 }
  0xe8   :  { %v773_v13 = vrot.slane %v772_v43, 2 }
  0xea   :  { %v774_v12 = vadd.f32 %v773_v13, %v772_v43 }
  0xec   :  { %v775_v36 = vrot.slane %v774_v12, 1 }
  0xee   :  { %v776_v42 = vadd.f32 %v775_v36, %v774_v12 }
  0xfe   :  { %v758_v59 = vpop.xlane.xlu1 %757 }
  0xff   :  { %v759_v55 = vsel %vm250_vm0, %v758_v59, 0.0 }
 0x100   :  { %v760_v46 = vrot.slane %v759_v55, 4 }
 0x102   :  { %v761_v41 = vadd.f32 %v760_v46, %v759_v55 }
 0x104   :  { %v762_v25 = vrot.slane %v761_v41, 2 }
 0x106   :  { %v763_v20 = vadd.f32 %v762_v25, %v761_v41 }
 0x108   :  { %v764_v17 = vrot.slane %v763_v20, 1 }
 0x10a   :  { %v765_v57 = vadd.f32 %v764_v17, %v763_v20 }
 0x148   :  { %v780_v24 = vpop.xlane.xlu0 %779 }
 0x149   :  { %v781_v61 = vsel %vm250_vm0, %v780_v24, 0.0 }
 0x14a   :  { %v782_v14 = vrot.slane %v781_v61, 4 }
 0x14c   :  { %v783_v6 = vadd.f32 %v782_v14, %v781_v61 }
 0x14e   :  { %v784_v2 = vrot.slane %v783_v6, 2 }
 0x14f   :  { %v747_v49 = vpop.xlane.xlu1 %746 }
 0x150   :  { %v748_v3 = vsel %vm250_vm0, %v747_v49, 0.0  ;;  %v785_v62 = vadd.f32 %v784_v2, %v783_v6 }
 0x151   :  { %v749_v39 = vrot.slane %v748_v3, 4 }
 0x152   :  { %v786_v9 = vrot.slane %v785_v62, 1 }
 0x153   :  { %v750_v15 = vadd.f32 %v749_v39, %v748_v3 }
 0x154   :  { %v787_v33 = vadd.f32 %v786_v9, %v785_v62 }
 0x155   :  { %v751_v28 = vrot.slane %v750_v15, 2 }
 0x156   :  { %v794_v19 = vsel %vm793_vm6, %v776_v42, %v787_v33 }
 0x157   :  { %v752_v11 = vadd.f32 %v751_v28, %v750_v15  ;;  %v795_v16 = vsel %vm792_vm4, %v765_v57, %v794_v19 }
 0x158   :  { %v736_v47 = vpop.xlane.xlu0 %735 }
 0x159   :  { %v737_v53 = vsel %vm250_vm0, %v736_v47, 0.0  ;;  %v753_v23 = vrot.slane %v752_v11, 1 }
 0x15a   :  { %v738_v54 = vrot.slane %v737_v53, 4 }
 0x15b   :  { %v754_v7 = vadd.f32 %v753_v23, %v752_v11 }
 0x15c   :  { %v739_v63 = vadd.f32 %v738_v54, %v737_v53 }
 0x15d   :  { %v796_v29 = vsel %vm791_vm11, %v754_v7, %v795_v16 }
 0x15e   :  { %v740_v0 = vrot.slane %v739_v63, 2 }
 0x160   :  { %v741_v27 = vadd.f32 %v740_v0, %v739_v63 }
 0x162   :  { %v742_v10 = vrot.slane %v741_v27, 1 }
 0x164   :  { %v743_v18 = vadd.f32 %v742_v10, %v741_v27 }
 0x166   :  { %v797_v5 = vsel %vm790_vm2, %v743_v18, %v796_v29 }
 0x167   :  { %798 = vst [vmem:[#allocation12] sm:$0xff] %v797_v5 }
 0x168   :  { %974 = shalt.err (!%p971_p0)
}
 0x169   :  { %808 = dma.vmem_to_hbm [thread:$0]  %s806_s1, 128, %s1635_s2, [#allocation9]  }
 0x16a   :  { %987 = dma.done.wait [#allocation9], 128  }
 0x16b   :  { %988 = vsyncadd [#allocation9], 4294967168 }
 0x16c   :  { %812 = vsyncpa [#allocation8], 1 }
 0x16d   :  { %813 = vsyncpa [#allocation11], 1 }
 0x16e   :  { %814 = vsyncpa [#allocation9], 1 }

</bundles_post_ra>
